<compile_context>
chip_gen: v7x
topology: tpu7x:2x2x1
jax: 0.10.0
libtpu: 0.0.40
codegen_flags: <defaults>
</compile_context>

<pallas_src>
import functools

import jax
import jax.numpy as jnp
from jax import lax
from jax.experimental import pallas as pl
from jax.experimental.pallas import tpu as pltpu

DILATIONS = (1, 2, 4, 8, 1, 2, 4, 8)
_SUBLANE = 8
_LANE = 128


def _round_up(x, m):
    return -(-x // m) * m


# ------------------------------ Pallas kernel --------------------------------

def wavenet_kernel(x_ref,
                   w1_ref, b1_ref, wmid_ref, bmid_ref, wout_ref, bout_ref,
                   o_ref, *, seq_len):
    """One grid step = a group of whole samples, laid out (channels, time)."""
    h = x_ref[...]                                   # (C_pad, T) f32, T = nb*L
    t = h.shape[1]

    # Intra-sample position of each lane (samples of length seq_len are
    # concatenated along the lane axis).  Computed in-kernel: no pos DMA.
    t_idx = lax.broadcasted_iota(jnp.int32, (1, t), 1)
    if (seq_len & (seq_len - 1)) == 0:
        pos = jnp.bitwise_and(t_idx, seq_len - 1)
    else:
        pos = lax.rem(t_idx, jnp.int32(seq_len))

    # Hoisted 'same'-padding / sample-boundary masks: only 4 distinct
    # dilations, so 7 compares total instead of 16 per-layer compares.
    masks = {}
    for d in sorted(set(DILATIONS)):
        left = d // 2
        right = d - left
        m_left = None if left == 0 else (pos >= left)
        m_right = pos < (seq_len - right)
        masks[d] = (left, right, m_left, m_right)

    def fused_taps(v, dil):
        """[v[t-left]; v[t+right]] stacked on the contraction axis (bf16)."""
        left, right, m_left, m_right = masks[dil]
        lanes = v.shape[1]
        # pltpu.roll uses the XLU slot; the VPU select zeroes taps that fall
        # outside the current sample ('same' zero pad, no cross-sample leak).
        if left == 0:
            x0 = v
        else:
            x0 = jnp.where(m_left, pltpu.roll(v, left, axis=1), 0.0)
        x1 = jnp.where(m_right, pltpu.roll(v, lanes - right, axis=1), 0.0)
        # Cast once after the f32 concat -> bf16 MXU operand.
        return jnp.concatenate([x0, x1], axis=0).astype(jnp.bfloat16)

    # 8 dilated conv layers; the two taps of each are one MXU contraction.
    for li, dil in enumerate(DILATIONS):
        if li == 0:
            w = w1_ref[...]                          # (H, 2*C_pad) bf16
            b = b1_ref[...]                          # (H, 1)       f32
        else:
            w = wmid_ref[li - 1]                     # (H, 2*H) bf16 (static slice)
            b = bmid_ref[li - 1]                     # (H, 1)   f32
        y = jnp.dot(w, fused_taps(h, dil),
                    preferred_element_type=jnp.float32) + b
        h = jnp.maximum(y, 0.0)                      # ReLU (f32)

    # conv_out: kernel_size=1 -> plain matmul, then the final ReLU.
    out = jnp.dot(wout_ref[...], h.astype(jnp.bfloat16),
                  preferred_element_type=jnp.float32) + bout_ref[...]
    o_ref[...] = jnp.maximum(out, 0.0).astype(o_ref.dtype)


# ----------------------------- parameter packing -----------------------------

def pack_params(params, c_pad):
    """Fuse the two conv taps into one contraction axis; weights -> bf16."""
    w1, b1 = params["w1"], params["b1"]            # (H, Cin, 2), (H,)
    wmid, bmid = params["wmid"], params["bmid"]    # (7, H, H, 2), (7, H)
    wout, bout = params["wout"], params["bout"]    # (O, H, 1), (O,)

    h_dim, c_in, _ = w1.shape
    w1p = jnp.zeros((h_dim, c_pad, 2), jnp.float32).at[:, :c_in, :].set(w1)
    w1f = jnp.concatenate([w1p[:, :, 0], w1p[:, :, 1]], axis=1)       # (H, 2*Cpad)
    wmf = jnp.concatenate([wmid[..., 0], wmid[..., 1]], axis=2)       # (7, H, 2H)
    wof = wout[:, :, 0]                                               # (O, H)
    return (w1f.astype(jnp.bfloat16), b1[:, None].astype(jnp.float32),
            wmf.astype(jnp.bfloat16), bmid[:, :, None].astype(jnp.float32),
            wof.astype(jnp.bfloat16), bout[:, None].astype(jnp.float32))


# --------------------------------- wrapper -----------------------------------

def _pick_batch_group(n, l, c_pad, hidden, o_dim):
    """Samples per grid step: whole samples, lane-dense, big but VMEM-safe."""
    divisors = [d for d in range(1, n + 1) if n % d == 0]
    valid = [d for d in divisors if d == n or (d * l) % _LANE == 0]

    def step_bytes(d):
        t = d * l
        return (hidden * t * 4            # h (f32)
                + 2 * hidden * t * 2      # fused taps (bf16)
                + hidden * t * 4          # pre-ReLU y (f32)
                + 2 * c_pad * t * 4       # x block, double-buffered
                + 2 * o_dim * t * 4)      # out block, double-buffered

    budget = 8 * 1024 * 1024              # headroom under the 32 MiB scoped default
    fits = [d for d in valid if d * l <= 16384 and step_bytes(d) <= budget]
    if not fits:
        return min(valid)
    best = max(fits)
    # Prefer >= 2 grid steps when per-step lanes stay wide: keeps the pipeline
    # busy and lets v7x shard the "parallel" axis across both TensorCores.
    split = [d for d in fits if n // d >= 2]
    if split:
        cand = max(split)
        if cand * l >= max(4096, (best * l) // 2):
            return cand
    return best


def wavenet_forward(x_ncl, params, *, interpret=False):
    """x_ncl: (N, C_in, L) like the PyTorch module.  Returns (N, L, output_dim)."""
    x_ncl = x_ncl.astype(jnp.float32)
    n, c_in, l = x_ncl.shape
    h_dim = params["w1"].shape[0]      # assumed multiple of 8 (sublane width)
    o_dim = params["wout"].shape[0]
    c_pad = _round_up(c_in, _SUBLANE)

    w1f, b1c, wmf, bmc, wof, boc = pack_params(params, c_pad)

    nb = _pick_batch_group(n, l, c_pad, h_dim, o_dim)
    t = nb * l

    # Channels-first with the batch folded onto the (lane) time axis.
    x_flat = jnp.transpose(x_ncl, (1, 0, 2)).reshape(c_in, n * l)
    x_flat = jnp.zeros((c_pad, n * l), jnp.float32).at[:c_in].set(x_flat)

    def const_spec(arr):
        # Full-array block with a constant index_map: the pipeline fetches it
        # once (per core) and keeps it VMEM-resident — no serialized manual
        # copies, and it is compatible with a "parallel" grid axis.
        nd = arr.ndim
        return pl.BlockSpec(arr.shape, lambda g: (0,) * nd)

    out_flat = pl.pallas_call(
        functools.partial(wavenet_kernel, seq_len=l),
        out_shape=jax.ShapeDtypeStruct((o_dim, n * l), jnp.float32),
        grid=(n // nb,),
        in_specs=[
            pl.BlockSpec((c_pad, t), lambda g: (0, g)),     # activations
            const_spec(w1f), const_spec(b1c),               # layer 1
            const_spec(wmf), const_spec(bmc),               # layers 2..8
            const_spec(wof), const_spec(boc),               # conv_out
        ],
        # TODO(synk): for long grids with short per-step compute, deepen the
        # activation/output pipeline with pipeline_mode=pl.Buffered(3).
        out_specs=pl.BlockSpec((o_dim, t), lambda g: (0, g)),
        compiler_params=pltpu.CompilerParams(
            # No persistent load-once scratch any more, so the grid axis can be
            # "parallel" (v7x shards steps across both TensorCores; no-op on
            # single-core v5e/v6e).  Default scoped-VMEM limit is ample at this
            # footprint, so we do not request v7x's full 64 MiB.
            dimension_semantics=("parallel",),
        ),
        interpret=interpret,
    )(x_flat, w1f, b1c, wmf, bmc, wof, boc)

    # (O, N*L) -> (N, L, O): wrapper-side layout plumbing, not compute.
    return jnp.transpose(out_flat.reshape(o_dim, n, l), (1, 2, 0))


# ----------------------- deterministic parameter init ------------------------

def _orthogonal(key, rows, cols, gain):
    """Mimic torch.nn.init.orthogonal_ on a (rows, cols) matrix."""
    big, small = max(rows, cols), min(rows, cols)
    a = jax.random.normal(key, (big, small), dtype=jnp.float32)
    q, r = jnp.linalg.qr(a)
    q = q * jnp.sign(jnp.diag(r))
    if rows < cols:
        q = q.T
    return (gain * q[:rows, :cols]).astype(jnp.float32)


def init_params(key, input_dim, hidden_dim, output_dim=2):
    """Torch-layout weights (out, in, k).  The PyTorch module zero-inits the
    biases; small random biases are used here so the kernel's bias path is
    actually exercised by the numerical check."""
    gain = 2.0 ** 0.5          # torch.nn.init.calculate_gain('relu')
    keys = jax.random.split(key, 12)

    def conv_w(k, out_ch, in_ch, ksize):
        w = _orthogonal(k, out_ch, in_ch * ksize, gain)
        return w.reshape(out_ch, in_ch, ksize)

    w1 = conv_w(keys[0], hidden_dim, input_dim, 2)                    # (H, Cin, 2)
    wmid = jnp.stack([conv_w(keys[1 + i], hidden_dim, hidden_dim, 2)
                      for i in range(7)], axis=0)                     # (7, H, H, 2)
    wout = conv_w(keys[8], output_dim, hidden_dim, 1)                 # (O, H, 1)
    b1 = 0.1 * jax.random.normal(keys[9], (hidden_dim,), jnp.float32)
    bmid = 0.1 * jax.random.normal(keys[10], (7, hidden_dim), jnp.float32)
    bout = 0.1 * jax.random.normal(keys[11], (output_dim,), jnp.float32)
    return dict(w1=w1, b1=b1, wmid=wmid, bmid=bmid, wout=wout, bout=bout)


# ------------------------------- JAX reference --------------------------------

def reference_forward(x_ncl, params):
    """Independent reference: XLA dilated conv with PyTorch's padding='same'
    split (left = d // 2, right = d - left), matching nn.Conv1d semantics."""
    h = x_ncl.astype(jnp.float32)
    weights = [params["w1"]] + [params["wmid"][i] for i in range(7)]
    biases = [params["b1"]] + [params["bmid"][i] for i in range(7)]
    for d, w, b in zip(DILATIONS, weights, biases):
        left = d // 2
        h = lax.conv_general_dilated(
            h, w, window_strides=(1,), padding=[(left, d - left)],
            rhs_dilation=(d,), dimension_numbers=("NCH", "OIH", "NCH"),
            precision=lax.Precision.HIGHEST)
        h = jnp.maximum(h + b[None, :, None], 0.0)
    out = lax.conv_general_dilated(
        h, params["wout"], window_strides=(1,), padding=[(0, 0)],
        dimension_numbers=("NCH", "OIH", "NCH"),
        precision=lax.Precision.HIGHEST)
    out = out + params["bout"][None, :, None]
    return jnp.maximum(jnp.transpose(out, (0, 2, 1)), 0.0)


# ----------------------------------- main -------------------------------------

if __name__ == "__main__":
    # L chosen as a multiple of 128 so the time/lane axis is dense; shapes
    # otherwise follow the module (batch=2, input channels=4, hidden=32, out=2).
    N, C_IN, L = 2, 4, 128
    HIDDEN, OUT = 32, 2

    key = jax.random.PRNGKey(0)
    k_x, k_p = jax.random.split(key)
    x = jax.random.normal(k_x, (N, C_IN, L), dtype=jnp.float32)   # PyTorch NCL input
    params = init_params(k_p, C_IN, HIDDEN, OUT)

    out = jax.block_until_ready(jax.jit(wavenet_forward)(x, params))
    ref = jax.block_until_ready(reference_forward(x, params))

    assert out.shape == (N, L, OUT), out.shape
    err = float(jnp.max(jnp.abs(out - ref)))
    scale = float(jnp.max(jnp.abs(ref)))
    # bf16 MXU operands (f32 accumulation) vs a HIGHEST-precision f32 reference:
    # tolerance loosened accordingly (structural bugs would be O(scale) errors).
    assert err <= 0.1 * (1.0 + scale), f"max abs err {err} (ref scale {scale})"
    print("KERNEL_OK")
</pallas_src>

<mosaic_0001>
module attributes {stable_mosaic.version = 11 : i64} {
  func.func @wavenet_kernel(%arg0: i32, %arg1: memref<8x256xf32, #tpu.memory_space<vmem>>, %arg2: memref<32x16xbf16, #tpu.memory_space<vmem>>, %arg3: memref<32x1xf32, #tpu.memory_space<vmem>>, %arg4: memref<7x32x64xbf16, #tpu.memory_space<vmem>>, %arg5: memref<7x32x1xf32, #tpu.memory_space<vmem>>, %arg6: memref<2x32xbf16, #tpu.memory_space<vmem>>, %arg7: memref<2x1xf32, #tpu.memory_space<vmem>>, %arg8: memref<2x256xf32, #tpu.memory_space<vmem>>) attributes {dimension_semantics = [#tpu.dimension_semantics<parallel>], iteration_bounds = array<i64: 1>, scalar_prefetch = 0 : i64, scratch_operands = 0 : i64, tpu.core_type = #tpu.core_type<tc>, window_params = [{transform_indices = @transform_0, window_bounds = array<i64: 8, 256>}, {pipeline_mode = #tpu.pipeline_mode<synchronous>, transform_indices = @transform_1, window_bounds = array<i64: 32, 16>}, {pipeline_mode = #tpu.pipeline_mode<synchronous>, transform_indices = @transform_2, window_bounds = array<i64: 32, 1>}, {pipeline_mode = #tpu.pipeline_mode<synchronous>, transform_indices = @transform_3, window_bounds = array<i64: 7, 32, 64>}, {pipeline_mode = #tpu.pipeline_mode<synchronous>, transform_indices = @transform_4, window_bounds = array<i64: 7, 32, 1>}, {pipeline_mode = #tpu.pipeline_mode<synchronous>, transform_indices = @transform_5, window_bounds = array<i64: 2, 32>}, {pipeline_mode = #tpu.pipeline_mode<synchronous>, transform_indices = @transform_6, window_bounds = array<i64: 2, 1>}, {transform_indices = @transform_7, window_bounds = array<i64: 2, 256>}]} {
    %c0 = arith.constant 0 : index
    %c0_0 = arith.constant 0 : index
    %0 = vector.load %arg1[%c0, %c0_0] : memref<8x256xf32, #tpu.memory_space<vmem>>, vector<8x256xf32>
    %1 = tpu.iota {dimensions = array<i32: 1>} : vector<1x256xi32>
    %c127_i32 = arith.constant 127 : i32
    %2 = vector.broadcast %c127_i32 : i32 to vector<1x256xi32>
    %3 = arith.andi %1, %2 : vector<1x256xi32>
    %c127_i32_1 = arith.constant 127 : i32
    %4 = vector.broadcast %c127_i32_1 : i32 to vector<1x256xi32>
    %5 = arith.cmpi slt, %3, %4 : vector<1x256xi32>
    %c1_i32 = arith.constant 1 : i32
    %6 = vector.broadcast %c1_i32 : i32 to vector<1x256xi32>
    %7 = arith.cmpi sge, %3, %6 : vector<1x256xi32>
    %c127_i32_2 = arith.constant 127 : i32
    %8 = vector.broadcast %c127_i32_2 : i32 to vector<1x256xi32>
    %9 = arith.cmpi slt, %3, %8 : vector<1x256xi32>
    %c2_i32 = arith.constant 2 : i32
    %10 = vector.broadcast %c2_i32 : i32 to vector<1x256xi32>
    %11 = arith.cmpi sge, %3, %10 : vector<1x256xi32>
    %c126_i32 = arith.constant 126 : i32
    %12 = vector.broadcast %c126_i32 : i32 to vector<1x256xi32>
    %13 = arith.cmpi slt, %3, %12 : vector<1x256xi32>
    %c4_i32 = arith.constant 4 : i32
    %14 = vector.broadcast %c4_i32 : i32 to vector<1x256xi32>
    %15 = arith.cmpi sge, %3, %14 : vector<1x256xi32>
    %c124_i32 = arith.constant 124 : i32
    %16 = vector.broadcast %c124_i32 : i32 to vector<1x256xi32>
    %17 = arith.cmpi slt, %3, %16 : vector<1x256xi32>
    %c0_3 = arith.constant 0 : index
    %c0_4 = arith.constant 0 : index
    %18 = vector.load %arg2[%c0_3, %c0_4] : memref<32x16xbf16, #tpu.memory_space<vmem>>, vector<32x16xbf16>
    %c0_5 = arith.constant 0 : index
    %c0_6 = arith.constant 0 : index
    %19 = vector.load %arg3[%c0_5, %c0_6] : memref<32x1xf32, #tpu.memory_space<vmem>>, vector<32x1xf32>
    %c255_i32 = arith.constant 255 : i32
    %20 = tpu.dynamic_rotate %0 by %c255_i32 dim 1 : vector<8x256xf32>, i32 -> vector<8x256xf32>
    %cst = arith.constant 0.000000e+00 : f32
    %21 = vector.shape_cast %5 : vector<1x256xi1> to vector<1x256xi1>
    %22 = vector.broadcast %21 : vector<1x256xi1> to vector<8x256xi1>
    %23 = vector.broadcast %cst : f32 to vector<8x256xf32>
    %24 = arith.select %22, %20, %23 : vector<8x256xi1>, vector<8x256xf32>
    %25 = tpu.concatenate %0, %24 in 0 : vector<8x256xf32>, vector<8x256xf32> -> vector<16x256xf32>
    %26 = arith.truncf %25 : vector<16x256xf32> to vector<16x256xbf16>
    %cst_7 = arith.constant dense<0.000000e+00> : vector<32x256xf32>
    %27 = tpu.matmul %18, %26, %cst_7 {dimension_numbers = #tpu.dot_dimension_numbers<[1], [0], [0], [1], [0, 0, 1, 1], [], []>} : vector<32x16xbf16>, vector<16x256xbf16>, vector<32x256xf32> -> vector<32x256xf32>
    %28 = vector.broadcast %19 : vector<32x1xf32> to vector<32x256xf32>
    %29 = arith.addf %27, %28 : vector<32x256xf32>
    %cst_8 = arith.constant 0.000000e+00 : f32
    %30 = vector.broadcast %cst_8 : f32 to vector<32x256xf32>
    %31 = arith.maximumf %29, %30 : vector<32x256xf32>
    %c0_9 = arith.constant 0 : index
    %c0_10 = arith.constant 0 : index
    %c0_11 = arith.constant 0 : index
    %32 = vector.load %arg4[%c0_9, %c0_10, %c0_11] : memref<7x32x64xbf16, #tpu.memory_space<vmem>>, vector<1x32x64xbf16>
    %33 = vector.shape_cast %32 : vector<1x32x64xbf16> to vector<32x64xbf16>
    %c0_12 = arith.constant 0 : index
    %c0_13 = arith.constant 0 : index
    %c0_14 = arith.constant 0 : index
    %34 = vector.load %arg5[%c0_12, %c0_13, %c0_14] : memref<7x32x1xf32, #tpu.memory_space<vmem>>, vector<1x32x1xf32>
    %35 = vector.shape_cast %34 : vector<1x32x1xf32> to vector<32x1xf32>
    %c1_i32_15 = arith.constant 1 : i32
    %36 = tpu.dynamic_rotate %31 by %c1_i32_15 dim 1 : vector<32x256xf32>, i32 -> vector<32x256xf32>
    %cst_16 = arith.constant 0.000000e+00 : f32
    %37 = vector.shape_cast %7 : vector<1x256xi1> to vector<1x256xi1>
    %38 = vector.broadcast %37 : vector<1x256xi1> to vector<32x256xi1>
    %39 = vector.broadcast %cst_16 : f32 to vector<32x256xf32>
    %40 = arith.select %38, %36, %39 : vector<32x256xi1>, vector<32x256xf32>
    %c255_i32_17 = arith.constant 255 : i32
    %41 = tpu.dynamic_rotate %31 by %c255_i32_17 dim 1 : vector<32x256xf32>, i32 -> vector<32x256xf32>
    %cst_18 = arith.constant 0.000000e+00 : f32
    %42 = vector.shape_cast %9 : vector<1x256xi1> to vector<1x256xi1>
    %43 = vector.broadcast %42 : vector<1x256xi1> to vector<32x256xi1>
    %44 = vector.broadcast %cst_18 : f32 to vector<32x256xf32>
    %45 = arith.select %43, %41, %44 : vector<32x256xi1>, vector<32x256xf32>
    %46 = tpu.concatenate %40, %45 in 0 : vector<32x256xf32>, vector<32x256xf32> -> vector<64x256xf32>
    %47 = arith.truncf %46 : vector<64x256xf32> to vector<64x256xbf16>
    %cst_19 = arith.constant dense<0.000000e+00> : vector<32x256xf32>
    %48 = tpu.matmul %33, %47, %cst_19 {dimension_numbers = #tpu.dot_dimension_numbers<[1], [0], [0], [1], [0, 0, 1, 1], [], []>} : vector<32x64xbf16>, vector<64x256xbf16>, vector<32x256xf32> -> vector<32x256xf32>
    %49 = vector.broadcast %35 : vector<32x1xf32> to vector<32x256xf32>
    %50 = arith.addf %48, %49 : vector<32x256xf32>
    %cst_20 = arith.constant 0.000000e+00 : f32
    %51 = vector.broadcast %cst_20 : f32 to vector<32x256xf32>
    %52 = arith.maximumf %50, %51 : vector<32x256xf32>
    %c1 = arith.constant 1 : index
    %c0_21 = arith.constant 0 : index
    %c0_22 = arith.constant 0 : index
    %53 = vector.load %arg4[%c1, %c0_21, %c0_22] : memref<7x32x64xbf16, #tpu.memory_space<vmem>>, vector<1x32x64xbf16>
    %54 = vector.shape_cast %53 : vector<1x32x64xbf16> to vector<32x64xbf16>
    %c1_23 = arith.constant 1 : index
    %c0_24 = arith.constant 0 : index
    %c0_25 = arith.constant 0 : index
    %55 = vector.load %arg5[%c1_23, %c0_24, %c0_25] : memref<7x32x1xf32, #tpu.memory_space<vmem>>, vector<1x32x1xf32>
    %56 = vector.shape_cast %55 : vector<1x32x1xf32> to vector<32x1xf32>
    %c2_i32_26 = arith.constant 2 : i32
    %57 = tpu.dynamic_rotate %52 by %c2_i32_26 dim 1 : vector<32x256xf32>, i32 -> vector<32x256xf32>
    %cst_27 = arith.constant 0.000000e+00 : f32
    %58 = vector.shape_cast %11 : vector<1x256xi1> to vector<1x256xi1>
    %59 = vector.broadcast %58 : vector<1x256xi1> to vector<32x256xi1>
    %60 = vector.broadcast %cst_27 : f32 to vector<32x256xf32>
    %61 = arith.select %59, %57, %60 : vector<32x256xi1>, vector<32x256xf32>
    %c254_i32 = arith.constant 254 : i32
    %62 = tpu.dynamic_rotate %52 by %c254_i32 dim 1 : vector<32x256xf32>, i32 -> vector<32x256xf32>
    %cst_28 = arith.constant 0.000000e+00 : f32
    %63 = vector.shape_cast %13 : vector<1x256xi1> to vector<1x256xi1>
    %64 = vector.broadcast %63 : vector<1x256xi1> to vector<32x256xi1>
    %65 = vector.broadcast %cst_28 : f32 to vector<32x256xf32>
    %66 = arith.select %64, %62, %65 : vector<32x256xi1>, vector<32x256xf32>
    %67 = tpu.concatenate %61, %66 in 0 : vector<32x256xf32>, vector<32x256xf32> -> vector<64x256xf32>
    %68 = arith.truncf %67 : vector<64x256xf32> to vector<64x256xbf16>
    %cst_29 = arith.constant dense<0.000000e+00> : vector<32x256xf32>
    %69 = tpu.matmul %54, %68, %cst_29 {dimension_numbers = #tpu.dot_dimension_numbers<[1], [0], [0], [1], [0, 0, 1, 1], [], []>} : vector<32x64xbf16>, vector<64x256xbf16>, vector<32x256xf32> -> vector<32x256xf32>
    %70 = vector.broadcast %56 : vector<32x1xf32> to vector<32x256xf32>
    %71 = arith.addf %69, %70 : vector<32x256xf32>
    %cst_30 = arith.constant 0.000000e+00 : f32
    %72 = vector.broadcast %cst_30 : f32 to vector<32x256xf32>
    %73 = arith.maximumf %71, %72 : vector<32x256xf32>
    %c2 = arith.constant 2 : index
    %c0_31 = arith.constant 0 : index
    %c0_32 = arith.constant 0 : index
    %74 = vector.load %arg4[%c2, %c0_31, %c0_32] : memref<7x32x64xbf16, #tpu.memory_space<vmem>>, vector<1x32x64xbf16>
    %75 = vector.shape_cast %74 : vector<1x32x64xbf16> to vector<32x64xbf16>
    %c2_33 = arith.constant 2 : index
    %c0_34 = arith.constant 0 : index
    %c0_35 = arith.constant 0 : index
    %76 = vector.load %arg5[%c2_33, %c0_34, %c0_35] : memref<7x32x1xf32, #tpu.memory_space<vmem>>, vector<1x32x1xf32>
    %77 = vector.shape_cast %76 : vector<1x32x1xf32> to vector<32x1xf32>
    %c4_i32_36 = arith.constant 4 : i32
    %78 = tpu.dynamic_rotate %73 by %c4_i32_36 dim 1 : vector<32x256xf32>, i32 -> vector<32x256xf32>
    %cst_37 = arith.constant 0.000000e+00 : f32
    %79 = vector.shape_cast %15 : vector<1x256xi1> to vector<1x256xi1>
    %80 = vector.broadcast %79 : vector<1x256xi1> to vector<32x256xi1>
    %81 = vector.broadcast %cst_37 : f32 to vector<32x256xf32>
    %82 = arith.select %80, %78, %81 : vector<32x256xi1>, vector<32x256xf32>
    %c252_i32 = arith.constant 252 : i32
    %83 = tpu.dynamic_rotate %73 by %c252_i32 dim 1 : vector<32x256xf32>, i32 -> vector<32x256xf32>
    %cst_38 = arith.constant 0.000000e+00 : f32
    %84 = vector.shape_cast %17 : vector<1x256xi1> to vector<1x256xi1>
    %85 = vector.broadcast %84 : vector<1x256xi1> to vector<32x256xi1>
    %86 = vector.broadcast %cst_38 : f32 to vector<32x256xf32>
    %87 = arith.select %85, %83, %86 : vector<32x256xi1>, vector<32x256xf32>
    %88 = tpu.concatenate %82, %87 in 0 : vector<32x256xf32>, vector<32x256xf32> -> vector<64x256xf32>
    %89 = arith.truncf %88 : vector<64x256xf32> to vector<64x256xbf16>
    %cst_39 = arith.constant dense<0.000000e+00> : vector<32x256xf32>
    %90 = tpu.matmul %75, %89, %cst_39 {dimension_numbers = #tpu.dot_dimension_numbers<[1], [0], [0], [1], [0, 0, 1, 1], [], []>} : vector<32x64xbf16>, vector<64x256xbf16>, vector<32x256xf32> -> vector<32x256xf32>
    %91 = vector.broadcast %77 : vector<32x1xf32> to vector<32x256xf32>
    %92 = arith.addf %90, %91 : vector<32x256xf32>
    %cst_40 = arith.constant 0.000000e+00 : f32
    %93 = vector.broadcast %cst_40 : f32 to vector<32x256xf32>
    %94 = arith.maximumf %92, %93 : vector<32x256xf32>
    %c3 = arith.constant 3 : index
    %c0_41 = arith.constant 0 : index
    %c0_42 = arith.constant 0 : index
    %95 = vector.load %arg4[%c3, %c0_41, %c0_42] : memref<7x32x64xbf16, #tpu.memory_space<vmem>>, vector<1x32x64xbf16>
    %96 = vector.shape_cast %95 : vector<1x32x64xbf16> to vector<32x64xbf16>
    %c3_43 = arith.constant 3 : index
    %c0_44 = arith.constant 0 : index
    %c0_45 = arith.constant 0 : index
    %97 = vector.load %arg5[%c3_43, %c0_44, %c0_45] : memref<7x32x1xf32, #tpu.memory_space<vmem>>, vector<1x32x1xf32>
    %98 = vector.shape_cast %97 : vector<1x32x1xf32> to vector<32x1xf32>
    %c255_i32_46 = arith.constant 255 : i32
    %99 = tpu.dynamic_rotate %94 by %c255_i32_46 dim 1 : vector<32x256xf32>, i32 -> vector<32x256xf32>
    %cst_47 = arith.constant 0.000000e+00 : f32
    %100 = vector.shape_cast %5 : vector<1x256xi1> to vector<1x256xi1>
    %101 = vector.broadcast %100 : vector<1x256xi1> to vector<32x256xi1>
    %102 = vector.broadcast %cst_47 : f32 to vector<32x256xf32>
    %103 = arith.select %101, %99, %102 : vector<32x256xi1>, vector<32x256xf32>
    %104 = tpu.concatenate %94, %103 in 0 : vector<32x256xf32>, vector<32x256xf32> -> vector<64x256xf32>
    %105 = arith.truncf %104 : vector<64x256xf32> to vector<64x256xbf16>
    %cst_48 = arith.constant dense<0.000000e+00> : vector<32x256xf32>
    %106 = tpu.matmul %96, %105, %cst_48 {dimension_numbers = #tpu.dot_dimension_numbers<[1], [0], [0], [1], [0, 0, 1, 1], [], []>} : vector<32x64xbf16>, vector<64x256xbf16>, vector<32x256xf32> -> vector<32x256xf32>
    %107 = vector.broadcast %98 : vector<32x1xf32> to vector<32x256xf32>
    %108 = arith.addf %106, %107 : vector<32x256xf32>
    %cst_49 = arith.constant 0.000000e+00 : f32
    %109 = vector.broadcast %cst_49 : f32 to vector<32x256xf32>
    %110 = arith.maximumf %108, %109 : vector<32x256xf32>
    %c4 = arith.constant 4 : index
    %c0_50 = arith.constant 0 : index
    %c0_51 = arith.constant 0 : index
    %111 = vector.load %arg4[%c4, %c0_50, %c0_51] : memref<7x32x64xbf16, #tpu.memory_space<vmem>>, vector<1x32x64xbf16>
    %112 = vector.shape_cast %111 : vector<1x32x64xbf16> to vector<32x64xbf16>
    %c4_52 = arith.constant 4 : index
    %c0_53 = arith.constant 0 : index
    %c0_54 = arith.constant 0 : index
    %113 = vector.load %arg5[%c4_52, %c0_53, %c0_54] : memref<7x32x1xf32, #tpu.memory_space<vmem>>, vector<1x32x1xf32>
    %114 = vector.shape_cast %113 : vector<1x32x1xf32> to vector<32x1xf32>
    %c1_i32_55 = arith.constant 1 : i32
    %115 = tpu.dynamic_rotate %110 by %c1_i32_55 dim 1 : vector<32x256xf32>, i32 -> vector<32x256xf32>
    %cst_56 = arith.constant 0.000000e+00 : f32
    %116 = vector.shape_cast %7 : vector<1x256xi1> to vector<1x256xi1>
    %117 = vector.broadcast %116 : vector<1x256xi1> to vector<32x256xi1>
    %118 = vector.broadcast %cst_56 : f32 to vector<32x256xf32>
    %119 = arith.select %117, %115, %118 : vector<32x256xi1>, vector<32x256xf32>
    %c255_i32_57 = arith.constant 255 : i32
    %120 = tpu.dynamic_rotate %110 by %c255_i32_57 dim 1 : vector<32x256xf32>, i32 -> vector<32x256xf32>
    %cst_58 = arith.constant 0.000000e+00 : f32
    %121 = vector.shape_cast %9 : vector<1x256xi1> to vector<1x256xi1>
    %122 = vector.broadcast %121 : vector<1x256xi1> to vector<32x256xi1>
    %123 = vector.broadcast %cst_58 : f32 to vector<32x256xf32>
    %124 = arith.select %122, %120, %123 : vector<32x256xi1>, vector<32x256xf32>
    %125 = tpu.concatenate %119, %124 in 0 : vector<32x256xf32>, vector<32x256xf32> -> vector<64x256xf32>
    %126 = arith.truncf %125 : vector<64x256xf32> to vector<64x256xbf16>
    %cst_59 = arith.constant dense<0.000000e+00> : vector<32x256xf32>
    %127 = tpu.matmul %112, %126, %cst_59 {dimension_numbers = #tpu.dot_dimension_numbers<[1], [0], [0], [1], [0, 0, 1, 1], [], []>} : vector<32x64xbf16>, vector<64x256xbf16>, vector<32x256xf32> -> vector<32x256xf32>
    %128 = vector.broadcast %114 : vector<32x1xf32> to vector<32x256xf32>
    %129 = arith.addf %127, %128 : vector<32x256xf32>
    %cst_60 = arith.constant 0.000000e+00 : f32
    %130 = vector.broadcast %cst_60 : f32 to vector<32x256xf32>
    %131 = arith.maximumf %129, %130 : vector<32x256xf32>
    %c5 = arith.constant 5 : index
    %c0_61 = arith.constant 0 : index
    %c0_62 = arith.constant 0 : index
    %132 = vector.load %arg4[%c5, %c0_61, %c0_62] : memref<7x32x64xbf16, #tpu.memory_space<vmem>>, vector<1x32x64xbf16>
    %133 = vector.shape_cast %132 : vector<1x32x64xbf16> to vector<32x64xbf16>
    %c5_63 = arith.constant 5 : index
    %c0_64 = arith.constant 0 : index
    %c0_65 = arith.constant 0 : index
    %134 = vector.load %arg5[%c5_63, %c0_64, %c0_65] : memref<7x32x1xf32, #tpu.memory_space<vmem>>, vector<1x32x1xf32>
    %135 = vector.shape_cast %134 : vector<1x32x1xf32> to vector<32x1xf32>
    %c2_i32_66 = arith.constant 2 : i32
    %136 = tpu.dynamic_rotate %131 by %c2_i32_66 dim 1 : vector<32x256xf32>, i32 -> vector<32x256xf32>
    %cst_67 = arith.constant 0.000000e+00 : f32
    %137 = vector.shape_cast %11 : vector<1x256xi1> to vector<1x256xi1>
    %138 = vector.broadcast %137 : vector<1x256xi1> to vector<32x256xi1>
    %139 = vector.broadcast %cst_67 : f32 to vector<32x256xf32>
    %140 = arith.select %138, %136, %139 : vector<32x256xi1>, vector<32x256xf32>
    %c254_i32_68 = arith.constant 254 : i32
    %141 = tpu.dynamic_rotate %131 by %c254_i32_68 dim 1 : vector<32x256xf32>, i32 -> vector<32x256xf32>
    %cst_69 = arith.constant 0.000000e+00 : f32
    %142 = vector.shape_cast %13 : vector<1x256xi1> to vector<1x256xi1>
    %143 = vector.broadcast %142 : vector<1x256xi1> to vector<32x256xi1>
    %144 = vector.broadcast %cst_69 : f32 to vector<32x256xf32>
    %145 = arith.select %143, %141, %144 : vector<32x256xi1>, vector<32x256xf32>
    %146 = tpu.concatenate %140, %145 in 0 : vector<32x256xf32>, vector<32x256xf32> -> vector<64x256xf32>
    %147 = arith.truncf %146 : vector<64x256xf32> to vector<64x256xbf16>
    %cst_70 = arith.constant dense<0.000000e+00> : vector<32x256xf32>
    %148 = tpu.matmul %133, %147, %cst_70 {dimension_numbers = #tpu.dot_dimension_numbers<[1], [0], [0], [1], [0, 0, 1, 1], [], []>} : vector<32x64xbf16>, vector<64x256xbf16>, vector<32x256xf32> -> vector<32x256xf32>
    %149 = vector.broadcast %135 : vector<32x1xf32> to vector<32x256xf32>
    %150 = arith.addf %148, %149 : vector<32x256xf32>
    %cst_71 = arith.constant 0.000000e+00 : f32
    %151 = vector.broadcast %cst_71 : f32 to vector<32x256xf32>
    %152 = arith.maximumf %150, %151 : vector<32x256xf32>
    %c6 = arith.constant 6 : index
    %c0_72 = arith.constant 0 : index
    %c0_73 = arith.constant 0 : index
    %153 = vector.load %arg4[%c6, %c0_72, %c0_73] : memref<7x32x64xbf16, #tpu.memory_space<vmem>>, vector<1x32x64xbf16>
    %154 = vector.shape_cast %153 : vector<1x32x64xbf16> to vector<32x64xbf16>
    %c6_74 = arith.constant 6 : index
    %c0_75 = arith.constant 0 : index
    %c0_76 = arith.constant 0 : index
    %155 = vector.load %arg5[%c6_74, %c0_75, %c0_76] : memref<7x32x1xf32, #tpu.memory_space<vmem>>, vector<1x32x1xf32>
    %156 = vector.shape_cast %155 : vector<1x32x1xf32> to vector<32x1xf32>
    %c4_i32_77 = arith.constant 4 : i32
    %157 = tpu.dynamic_rotate %152 by %c4_i32_77 dim 1 : vector<32x256xf32>, i32 -> vector<32x256xf32>
    %cst_78 = arith.constant 0.000000e+00 : f32
    %158 = vector.shape_cast %15 : vector<1x256xi1> to vector<1x256xi1>
    %159 = vector.broadcast %158 : vector<1x256xi1> to vector<32x256xi1>
    %160 = vector.broadcast %cst_78 : f32 to vector<32x256xf32>
    %161 = arith.select %159, %157, %160 : vector<32x256xi1>, vector<32x256xf32>
    %c252_i32_79 = arith.constant 252 : i32
    %162 = tpu.dynamic_rotate %152 by %c252_i32_79 dim 1 : vector<32x256xf32>, i32 -> vector<32x256xf32>
    %cst_80 = arith.constant 0.000000e+00 : f32
    %163 = vector.shape_cast %17 : vector<1x256xi1> to vector<1x256xi1>
    %164 = vector.broadcast %163 : vector<1x256xi1> to vector<32x256xi1>
    %165 = vector.broadcast %cst_80 : f32 to vector<32x256xf32>
    %166 = arith.select %164, %162, %165 : vector<32x256xi1>, vector<32x256xf32>
    %167 = tpu.concatenate %161, %166 in 0 : vector<32x256xf32>, vector<32x256xf32> -> vector<64x256xf32>
    %168 = arith.truncf %167 : vector<64x256xf32> to vector<64x256xbf16>
    %cst_81 = arith.constant dense<0.000000e+00> : vector<32x256xf32>
    %169 = tpu.matmul %154, %168, %cst_81 {dimension_numbers = #tpu.dot_dimension_numbers<[1], [0], [0], [1], [0, 0, 1, 1], [], []>} : vector<32x64xbf16>, vector<64x256xbf16>, vector<32x256xf32> -> vector<32x256xf32>
    %170 = vector.broadcast %156 : vector<32x1xf32> to vector<32x256xf32>
    %171 = arith.addf %169, %170 : vector<32x256xf32>
    %cst_82 = arith.constant 0.000000e+00 : f32
    %172 = vector.broadcast %cst_82 : f32 to vector<32x256xf32>
    %173 = arith.maximumf %171, %172 : vector<32x256xf32>
    %c0_83 = arith.constant 0 : index
    %c0_84 = arith.constant 0 : index
    %174 = vector.load %arg6[%c0_83, %c0_84] : memref<2x32xbf16, #tpu.memory_space<vmem>>, vector<2x32xbf16>
    %175 = arith.truncf %173 : vector<32x256xf32> to vector<32x256xbf16>
    %cst_85 = arith.constant dense<0.000000e+00> : vector<2x256xf32>
    %176 = tpu.matmul %174, %175, %cst_85 {dimension_numbers = #tpu.dot_dimension_numbers<[1], [0], [0], [1], [0, 0, 1, 1], [], []>} : vector<2x32xbf16>, vector<32x256xbf16>, vector<2x256xf32> -> vector<2x256xf32>
    %c0_86 = arith.constant 0 : index
    %c0_87 = arith.constant 0 : index
    %177 = vector.load %arg7[%c0_86, %c0_87] : memref<2x1xf32, #tpu.memory_space<vmem>>, vector<2x1xf32>
    %178 = vector.broadcast %177 : vector<2x1xf32> to vector<2x256xf32>
    %179 = arith.addf %176, %178 : vector<2x256xf32>
    %cst_88 = arith.constant 0.000000e+00 : f32
    %180 = vector.broadcast %cst_88 : f32 to vector<2x256xf32>
    %181 = arith.maximumf %179, %180 : vector<2x256xf32>
    %c0_89 = arith.constant 0 : index
    %c0_90 = arith.constant 0 : index
    %182 = vector.load %arg8[%c0_89, %c0_90] : memref<2x256xf32, #tpu.memory_space<vmem>>, vector<2x256xf32>
    tpu.vector_store %arg8[%c0_89, %c0_90], %181 {strides = array<i32>} : memref<2x256xf32, #tpu.memory_space<vmem>>, vector<2x256xf32>,
    return
  }
  func.func @transform_0(%arg0: i32) -> (i32, i32) {
    %c0_i32 = arith.constant 0 : i32
    %c0_i32_0 = arith.constant 0 : i32
    return %c0_i32, %arg0 : i32, i32
  }
  func.func @transform_1(%arg0: i32) -> (i32, i32) {
    %c0_i32 = arith.constant 0 : i32
    %c0_i32_0 = arith.constant 0 : i32
    %c0_i32_1 = arith.constant 0 : i32
    return %c0_i32, %c0_i32_0 : i32, i32
  }
  func.func @transform_2(%arg0: i32) -> (i32, i32) {
    %c0_i32 = arith.constant 0 : i32
    %c0_i32_0 = arith.constant 0 : i32
    %c0_i32_1 = arith.constant 0 : i32
    return %c0_i32, %c0_i32_0 : i32, i32
  }
  func.func @transform_3(%arg0: i32) -> (i32, i32, i32) {
    %c0_i32 = arith.constant 0 : i32
    %c0_i32_0 = arith.constant 0 : i32
    %c0_i32_1 = arith.constant 0 : i32
    %c0_i32_2 = arith.constant 0 : i32
    return %c0_i32, %c0_i32_0, %c0_i32_1 : i32, i32, i32
  }
  func.func @transform_4(%arg0: i32) -> (i32, i32, i32) {
    %c0_i32 = arith.constant 0 : i32
    %c0_i32_0 = arith.constant 0 : i32
    %c0_i32_1 = arith.constant 0 : i32
    %c0_i32_2 = arith.constant 0 : i32
    return %c0_i32, %c0_i32_0, %c0_i32_1 : i32, i32, i32
  }
  func.func @transform_5(%arg0: i32) -> (i32, i32) {
    %c0_i32 = arith.constant 0 : i32
    %c0_i32_0 = arith.constant 0 : i32
    %c0_i32_1 = arith.constant 0 : i32
    return %c0_i32, %c0_i32_0 : i32, i32
  }
  func.func @transform_6(%arg0: i32) -> (i32, i32) {
    %c0_i32 = arith.constant 0 : i32
    %c0_i32_0 = arith.constant 0 : i32
    %c0_i32_1 = arith.constant 0 : i32
    return %c0_i32, %c0_i32_0 : i32, i32
  }
  func.func @transform_7(%arg0: i32) -> (i32, i32) {
    %c0_i32 = arith.constant 0 : i32
    %c0_i32_0 = arith.constant 0 : i32
    return %c0_i32, %arg0 : i32, i32
  }
}

</mosaic_0001>

<bundles_post_ra>
// kernel: wavenet_forward.1
= control target key start
LH: loop header
LB: loop body
LE: loop exit
PB: predicated region body
PF: predicated region fallthrough
CT: control target
= control target key end

     0   :  { %v2057_v3 = vmov 0   ;;  %s2058_s28 = smov 127   ;;  %s2766_s0 = inlined_call_operand.vmem [shape: f32[8,256], index: 0, kind: input, shape index: {}]   ;;  %s2767_s1 = inlined_call_operand.vmem [shape: bf16[32,16], index: 1, kind: input, shape index: {}]   ;;  %s2768_s2 = inlined_call_operand.vmem [shape: f32[32,1], index: 2, kind: input, shape index: {}]   ;;  %s2769_s3 = inlined_call_operand.vmem [shape: bf16[7,32,64], index: 3, kind: input, shape index: {}]   ;;  %s2770_s4 = inlined_call_operand.vmem [shape: f32[7,32,1], index: 4, kind: input, shape index: {}]   ;;  %s2771_s5 = inlined_call_operand.vmem [shape: bf16[2,32], index: 5, kind: input, shape index: {}]   ;;  %s2772_s6 = inlined_call_operand.vmem [shape: f32[2,1], index: 6, kind: input, shape index: {}]   ;;  %s2773_s7 = inlined_call_operand.hbm [shape: f32[2,256], index: 7, kind: output, shape index: {}]  }
   0x1   :  { %v28_v0 = vld [vmem:[%s2766_s0] sm:$0xff]  ;;  %v29_v1 = vld [vmem:[%s2766_s0 + $0x8] sm:$0xff]  ;;  %139 = vmatprep.mubr.bf16.mxu0 %v2057_v3  ;;  %1756 = vset.pattern.permute.xlu1 %v2057_v3  ;;  %v53_v6 = vld [vmem:[%s2768_s2 + $0x10] sm:$0xff] }
   0x2   :  { %v1750_v2 = vpack.i.bf16 %v29_v1, %v28_v0  ;;  %1755 = vset.pattern.permute.xlu0 %v2057_v3  ;;  %322 = vmatprep.mubr.bf16.mxu1 %v2057_v3  ;;  %v52_v4 = vld [vmem:[%s2768_s2 + $0x8] sm:$0xff]  ;;  %v51_v5 = vld [vmem:[%s2768_s2] sm:$0xff]  ;;  %v54_v7 = vld [vmem:[%s2768_s2 + $0x18] sm:$0xff] }
   0x3   :  { %77 = vperm.xlu1 %1756, %v52_v4  }
   0x4   :  { %1751 = vrot.lane.b32.xlu0 %v1750_v2, %s2058_s28 }
   0x7   :  { %82 = vperm.xlu1 %1756, %v53_v6  }
   0x8   :  { %72 = vperm.xlu0 %1755, %v51_v5  }
   0x9   :  { %12 = vsyncpa [#allocation3], 0  ;;  %v30_v8 = vlaneseq  ;;  %vm2059_vm2 = vmmov 1   ;;  %v2017_v19 = vld [vmem:[%s2767_s1] sm:$0xff]   ;;  %vm100_vm5 = vcmask 130048   ;;  %v2018_v20 = vld [vmem:[%s2767_s1 + $0x8] sm:$0xff]  }
   0xa   :  { %s2060_s1 = smov 1   ;;  %v172_v53 = vld [vmem:[%s2770_s4] sm:$0xff]  ;;  %v173_v54 = vld [vmem:[%s2770_s4 + $0x8] sm:$0xff]  ;;  %v174_v55 = vld [vmem:[%s2770_s4 + $0x10] sm:$0xff]  ;;  %vm2779_vm13 = vcmask 523264   ;;  %s2061_s29 = smov 2  }
   0xb   :  { %87 = vperm.xlu1 %1756, %v54_v7   ;;  %v2129_v9 = vand.u32 127, %v30_v8  ;;  %v175_v56 = vld [vmem:[%s2770_s4 + $0x18] sm:$0xff]  ;;  %s2062_s30 = smov 126   ;;  %s2063_s18 = smov 4  }
   0xc   :  { %s2064_s19 = smov 124   ;;  %s2065_s12 = smov [#allocation2]  }
   0xd   :  { %v32_v10 = vadd.s32 128, %v2129_v9  ;;  %vm2780_vm0 = vcmp.lt.s32.totalorder %v2129_v9, 127  ;;  %vm2776_vm7 = vcmp.lt.s32.totalorder %v2129_v9, 1  ;;  %vm37_vm8 = vcmp.ge.s32.totalorder %v2129_v9, 1  ;;  %s1489_s2 = sshll.u32 %s2065_s12, 4  ;;  %s1490_s2 = int_to_ptr.vmem [resolvable:$true] %s1489_s2 }
   0xe   :  { %vm1502_vm4 = vmpackc.low %vm2780_vm0, %vm2059_vm2  ;;  %vm2775_vm14 = vcmp.lt.s32.totalorder %v2129_v9, 2  ;;  %s2033_s13 = scalar_lea.vmem %s1490_s2, 64  ;;  %p2038_p1 = scmp.lt.s32.totalorder %s1490_s2, %s1490_s2 }
   0xf   :  { %v2132_v11 = vand.u32 127, %v32_v10  ;;  %vm2187_vm10 = vmpackc.low %vm37_vm8, %vm37_vm8  ;;  %p2034_p0 = scmp.ne.s32.totalorder %s1490_s2, %s2033_s13  ;;  %p2039_p2 = scmp.lt.s32.totalorder %s2033_s13, %s2033_s13 }
  0x10   :  { %vm2225_vm12 = vmpackc.low %vm2780_vm0, %vm2780_vm0 }
  0x11   :  { %vm36_vm1 = vcmp.lt.s32.totalorder %v2132_v11, 127  ;;  %vm38_vm6 = vcmp.ge.s32.totalorder %v2132_v11, 1  ;;  %vm40_vm15 = vcmp.ge.s32.totalorder %v2132_v11, 2  ;;  %p2040_p3 = por %p2039_p2, %p2038_p1 }
  0x12   :  { %vm1499_vm3 = vmpackc.low %vm36_vm1, %vm2059_vm2 }
  0x13   :  { %vm2179_vm9 = vmpackc.low %vm38_vm6, %vm38_vm6  ;;  %p2041_p4 = pnand %p2040_p3, %p2034_p0 }
  0x14   :  { %vm2208_vm11 = vmpackc.low %vm36_vm1, %vm36_vm1  ;;  %vm39_vm1 = vcmp.ge.s32.totalorder %v2129_v9, 2 }
  0x15   :  { %vm2286_vm2 = vmpackc.low %vm40_vm15, %vm40_vm15  ;;  %vm2777_vm15 = vcmp.lt.s32.totalorder %v2129_v9, 4 }
  0x76   :  { %v1752_v12 = vpop.permute.xlu0 %1751 }
  0x77   :  { %v1754_v13 = vunpack.i.h.bf16 %v1752_v12  ;;  %v1753_v14 = vunpack.i.l.bf16 %v1752_v12 }
  0x79   :  { %v61_v15 = vsel %vm2780_vm0, %v1754_v13, %v1753_v14  ;;  %v60_v16 = vsel %vm2780_vm0, %v1753_v14, %v1754_v13 }
  0x7a   :  { %v1500_v17 = vpack.c.bf16 %v61_v15, %v29_v1  ;;  %v1503_v18 = vpack.c.bf16 %v60_v16, %v28_v0 }
  0x7c   :  { %1501 = vmatprep.subr.msk.bf16.mxu0 %vm1499_vm3, %v1500_v17  ;;  %vm2290_vm3 = vmpackc.low %vm39_vm1, %vm39_vm1  ;;  %vm44_vm1 = vcmp.ge.s32.totalorder %v2132_v11, 4 }
  0x7d   :  { %1504 = vmatpush1.bf16.msk.msra.mxu0 %vm1502_vm4, %v1503_v18  ;;  %vm2774_vm4 = vcmp.lt.s32.totalorder %v2129_v9, 126 }
  0x7e   :  { %vm2330_vm8 = vmpackc.low %vm2774_vm4, %vm2774_vm4 }
  0x80   :  { %1505 = vmatmul.mubr.msk.bf16.vlgmr.msra.gmra.mrb[0].mxu0 %vm100_vm5, %v2017_v19 }
  0x81   :  { %149 = vmatprep.mubr.bf16.mxu0 %v2057_v3 }
  0x82   :  { %v78_v21 = vpop.permute.xlu1 %77 }
  0x86   :  { %v83_v30 = vpop.permute.xlu1 %82 }
  0x87   :  { %v73_v22 = vpop.permute.xlu0 %72 }
  0x88   :  { %1506 = vmatmul.mubr.msk.bf16.gmra.mrb[4].mxu0 %vm100_vm5, %v2018_v20  ;;  %vm42_vm5 = vcmp.lt.s32.totalorder %v2132_v11, 126 }
  0x89   :  { %511 = vmatprep.mubr.bf16.mxu0 %v2057_v3  ;;  %vm2323_vm6 = vmpackc.low %vm42_vm5, %vm42_vm5  ;;  %vm43_vm5 = vcmp.ge.s32.totalorder %v2129_v9, 4 }
  0x8a   :  { %v88_v41 = vpop.permute.xlu1 %87 }
 0x153   :  { %v141_v23 = vpop.f32.mrb[0].mxu0 }
 0x154   :  { %v142_v24 = vadd.f32 %v141_v23, %v73_v22  ;;  %v143_v25 = vpop.f32.mrb[1].mxu0 }
 0x155   :  { %v144_v26 = vadd.f32 %v143_v25, %v73_v22  ;;  %v145_v27 = vpop.f32.mrb[2].mxu0 }
 0x156   :  { %v146_v28 = vadd.f32 %v145_v27, %v78_v21  ;;  %v147_v29 = vpop.f32.mrb[3].mxu0  ;;  %v160_v32 = vmax.f32 %v142_v24, 0.0 }
 0x157   :  { %v148_v31 = vadd.f32 %v147_v29, %v78_v21  ;;  %v161_v34 = vmax.f32 %v144_v26, 0.0 }
 0x158   :  { %v162_v33 = vmax.f32 %v146_v28, 0.0 }
 0x159   :  { %v163_v35 = vmax.f32 %v148_v31, 0.0 }
 0x15a   :  { %v1772_v36 = vpack.i.bf16 %v162_v33, %v160_v32 }
 0x15b   :  { %v1782_v37 = vpack.i.bf16 %v163_v35, %v161_v34  ;;  %v151_v38 = vpop.f32.mrb[4].mxu0 }
 0x15c   :  { %v152_v39 = vadd.f32 %v151_v38, %v83_v30  ;;  %v153_v40 = vpop.f32.mrb[5].mxu0  ;;  %1758 = vrot.lane.b32.xlu0 %v1772_v36, %s2060_s1 }
 0x15d   :  { %v154_v42 = vadd.f32 %v153_v40, %v83_v30  ;;  %v155_v43 = vpop.f32.mrb[6].mxu0  ;;  %1763 = vrot.lane.b32.xlu1 %v1782_v37, %s2060_s1 }
 0x15e   :  { %v156_v44 = vadd.f32 %v155_v43, %v88_v41  ;;  %v157_v45 = vpop.f32.mrb[7].mxu0  ;;  %v164_v47 = vmax.f32 %v152_v39, 0.0 }
 0x15f   :  { %v158_v46 = vadd.f32 %v157_v45, %v88_v41  ;;  %v165_v49 = vmax.f32 %v154_v42, 0.0 }
 0x160   :  { %v166_v48 = vmax.f32 %v156_v44, 0.0 }
 0x161   :  { %v167_v50 = vmax.f32 %v158_v46, 0.0 }
 0x162   :  { %v1787_v51 = vpack.i.bf16 %v166_v48, %v164_v47  ;;  %v2019_v48 = vld [vmem:[%s2769_s3] sm:$0xff]  }
 0x163   :  { %v1792_v52 = vpack.i.bf16 %v167_v50, %v165_v49  ;;  %v2020_v49 = vld [vmem:[%s2769_s3 + $0x8] sm:$0xff]  }
 0x164   :  { %1768 = vrot.lane.b32.xlu0 %v1787_v51, %s2060_s1 }
 0x165   :  { %1778 = vrot.lane.b32.xlu1 %v1792_v52, %s2060_s1 }
 0x168   :  { %1773 = vrot.lane.b32.xlu0 %v1772_v36, %s2058_s28 }
 0x169   :  { %1783 = vrot.lane.b32.xlu1 %v1782_v37, %s2058_s28 }
 0x16c   :  { %1788 = vrot.lane.b32.xlu0 %v1787_v51, %s2058_s28 }
 0x16d   :  { %1793 = vrot.lane.b32.xlu1 %v1792_v52, %s2058_s28 }
 0x170   :  { %255 = vperm.xlu0 %1755, %v172_v53  }
 0x171   :  { %260 = vperm.xlu1 %1756, %v173_v54  }
 0x174   :  { %265 = vperm.xlu0 %1755, %v174_v55  }
 0x175   :  { %270 = vperm.xlu1 %1756, %v175_v56  }
 0x1ce   :  { %v1759_v57 = vpop.permute.xlu0 %1758 }
 0x1cf   :  { %v1761_v58 = vunpack.i.h.bf16 %v1759_v57  ;;  %v1760_v59 = vunpack.i.l.bf16 %v1759_v57  ;;  %v1764_v60 = vpop.permute.xlu1 %1763 }
 0x1d0   :  { %v1766_v61 = vunpack.i.h.bf16 %v1764_v60  ;;  %v1765_v62 = vunpack.i.l.bf16 %v1764_v60 }
 0x1d2   :  { %v193_v63 = vsel %vm2776_vm7, %v1760_v59, %v1765_v62  ;;  %v194_v0 = vsel %vm2776_vm7, %v1761_v58, %v1766_v61  ;;  %v197_v2 = vsel %vm2776_vm7, %v1765_v62, %v1760_v59  ;;  %v198_v4 = vsel %vm2776_vm7, %v1766_v61, %v1761_v58 }
 0x1d3   :  { %v1510_v5 = vpack.c.bf16 %v194_v0, %v193_v63  ;;  %v1513_v7 = vpack.c.bf16 %v198_v4, %v197_v2 }
 0x1d5   :  { %1511 = vmatprep.subr.msk.bf16.mxu1 %vm2179_vm9, %v1510_v5 }
 0x1d6   :  { %v1769_v8 = vpop.permute.xlu0 %1768  ;;  %1514 = vmatpush1.bf16.msk.msra.mxu1 %vm2187_vm10, %v1513_v7 }
 0x1d7   :  { %v1771_v10 = vunpack.i.h.bf16 %v1769_v8  ;;  %v1770_v12 = vunpack.i.l.bf16 %v1769_v8  ;;  %v1779_v13 = vpop.permute.xlu1 %1778 }
 0x1d8   :  { %v1781_v14 = vunpack.i.h.bf16 %v1779_v13  ;;  %v1780_v15 = vunpack.i.l.bf16 %v1779_v13 }
 0x1da   :  { %v195_v16 = vsel %vm2776_vm7, %v1770_v12, %v1780_v15  ;;  %v196_v17 = vsel %vm2776_vm7, %v1771_v10, %v1781_v14  ;;  %v199_v18 = vsel %vm2776_vm7, %v1780_v15, %v1770_v12  ;;  %v200_v19 = vsel %vm2776_vm7, %v1781_v14, %v1771_v10  ;;  %v1774_v20 = vpop.permute.xlu0 %1773 }
 0x1db   :  { %v1516_v21 = vpack.c.bf16 %v196_v17, %v195_v16  ;;  %v1519_v22 = vpack.c.bf16 %v200_v19, %v199_v18  ;;  %v1776_v23 = vunpack.i.h.bf16 %v1774_v20  ;;  %v1775_v24 = vunpack.i.l.bf16 %v1774_v20  ;;  %v1784_v25 = vpop.permute.xlu1 %1783 }
 0x1dc   :  { %v1786_v26 = vunpack.i.h.bf16 %v1784_v25  ;;  %v1785_v27 = vunpack.i.l.bf16 %v1784_v25  ;;  %v1541_v25 = vld [vmem:[%s2770_s4 + $0x30] sm:$0xff]  ;;  %vm46_vm7 = vcmp.lt.s32.totalorder %v2132_v11, 124 }
 0x1dd   :  { %1517 = vmatprep.subr.msk.bf16.mxu1 %vm2179_vm9, %v1516_v21 }
 0x1de   :  { %v229_v29 = vsel %vm2780_vm0, %v1775_v24, %v1785_v27  ;;  %v230_v30 = vsel %vm2780_vm0, %v1776_v23, %v1786_v26  ;;  %v233_v31 = vsel %vm2780_vm0, %v1785_v27, %v1775_v24  ;;  %v234_v32 = vsel %vm2780_vm0, %v1786_v26, %v1776_v23  ;;  %v1789_v33 = vpop.permute.xlu0 %1788  ;;  %1520 = vmatpush1.bf16.msk.msra.mxu1 %vm2187_vm10, %v1519_v22  ;;  %v1539_v23 = vld [vmem:[%s2770_s4 + $0x20] sm:$0xff]  ;;  %v1540_v24 = vld [vmem:[%s2770_s4 + $0x28] sm:$0xff]  ;;  %v1542_v26 = vld [vmem:[%s2770_s4 + $0x38] sm:$0xff] }
 0x1df   :  { %v1522_v34 = vpack.c.bf16 %v234_v32, %v233_v31  ;;  %v1525_v35 = vpack.c.bf16 %v230_v30, %v229_v29  ;;  %v1791_v36 = vunpack.i.h.bf16 %v1789_v33  ;;  %v1790_v37 = vunpack.i.l.bf16 %v1789_v33  ;;  %v1794_v38 = vpop.permute.xlu1 %1793 }
 0x1e0   :  { %v1796_v40 = vunpack.i.h.bf16 %v1794_v38  ;;  %v1795_v41 = vunpack.i.l.bf16 %v1794_v38 }
 0x1e1   :  { %1523 = vmatprep.subr.msk.bf16.mxu1 %vm2208_vm11, %v1522_v34 }
 0x1e2   :  { %v231_v42 = vsel %vm2780_vm0, %v1790_v37, %v1795_v41  ;;  %v232_v43 = vsel %vm2780_vm0, %v1791_v36, %v1796_v40  ;;  %v235_v44 = vsel %vm2780_vm0, %v1795_v41, %v1790_v37  ;;  %v236_v45 = vsel %vm2780_vm0, %v1796_v40, %v1791_v36  ;;  %1526 = vmatpush1.bf16.msk.msra.mxu1 %vm2225_vm12, %v1525_v35 }
 0x1e3   :  { %v1528_v46 = vpack.c.bf16 %v236_v45, %v235_v44  ;;  %v1531_v47 = vpack.c.bf16 %v232_v43, %v231_v42 }
 0x1e5   :  { %1529 = vmatprep.subr.msk.bf16.mxu1 %vm2208_vm11, %v1528_v46 }
 0x1e6   :  { %1532 = vmatpush1.bf16.msk.msra.mxu1 %vm2225_vm12, %v1531_v47 }
 0x1e9   :  { %1533 = vmatmul.mubr.msk.bf16.vlgmr.msra.gmra.mrb[0].mxu1 %vm2779_vm13, %v2019_v48 }
 0x1ea   :  { %332 = vmatprep.mubr.bf16.mxu1 %v2057_v3 }
 0x1ef   :  { %v256_v50 = vpop.permute.xlu0 %255 }
 0x1f0   :  { %v261_v54 = vpop.permute.xlu1 %260 }
 0x1f1   :  { %1534 = vmatmul.mubr.msk.bf16.gmra.mrb[4].mxu1 %vm2779_vm13, %v2020_v49 }
 0x1f2   :  { %700 = vmatprep.mubr.bf16.mxu1 %v2057_v3 }
 0x1f3   :  { %v266_v2 = vpop.permute.xlu0 %265 }
 0x1f4   :  { %v271_v10 = vpop.permute.xlu1 %270 }
 0x2bc   :  { %v324_v51 = vpop.f32.mrb[0].mxu1 }
 0x2bd   :  { %v325_v52 = vadd.f32 %v324_v51, %v256_v50  ;;  %v326_v53 = vpop.f32.mrb[1].mxu1 }
 0x2be   :  { %v327_v55 = vadd.f32 %v326_v53, %v256_v50  ;;  %v328_v56 = vpop.f32.mrb[2].mxu1 }
 0x2bf   :  { %v329_v57 = vadd.f32 %v328_v56, %v261_v54  ;;  %v330_v58 = vpop.f32.mrb[3].mxu1  ;;  %v343_v60 = vmax.f32 %v325_v52, 0.0 }
 0x2c0   :  { %v331_v59 = vadd.f32 %v330_v58, %v261_v54  ;;  %v344_v62 = vmax.f32 %v327_v55, 0.0 }
 0x2c1   :  { %v345_v61 = vmax.f32 %v329_v57, 0.0 }
 0x2c2   :  { %v346_v63 = vmax.f32 %v331_v59, 0.0 }
 0x2c3   :  { %v1812_v0 = vpack.i.bf16 %v345_v61, %v343_v60 }
 0x2c4   :  { %v1822_v4 = vpack.i.bf16 %v346_v63, %v344_v62  ;;  %v334_v5 = vpop.f32.mrb[4].mxu1 }
 0x2c5   :  { %v335_v7 = vadd.f32 %v334_v5, %v266_v2  ;;  %v336_v8 = vpop.f32.mrb[5].mxu1  ;;  %1798 = vrot.lane.b32.xlu0 %v1812_v0, %s2061_s29 }
 0x2c6   :  { %v337_v12 = vadd.f32 %v336_v8, %v266_v2  ;;  %v338_v13 = vpop.f32.mrb[6].mxu1  ;;  %1803 = vrot.lane.b32.xlu1 %v1822_v4, %s2061_s29 }
 0x2c7   :  { %v339_v14 = vadd.f32 %v338_v13, %v271_v10  ;;  %v340_v15 = vpop.f32.mrb[7].mxu1  ;;  %v347_v17 = vmax.f32 %v335_v7, 0.0 }
 0x2c8   :  { %v341_v16 = vadd.f32 %v340_v15, %v271_v10  ;;  %v348_v19 = vmax.f32 %v337_v12, 0.0 }
 0x2c9   :  { %v349_v18 = vmax.f32 %v339_v14, 0.0 }
 0x2ca   :  { %v350_v20 = vmax.f32 %v341_v16, 0.0 }
 0x2cb   :  { %v1827_v21 = vpack.i.bf16 %v349_v18, %v347_v17 }
 0x2cc   :  { %v1832_v22 = vpack.i.bf16 %v350_v20, %v348_v19 }
 0x2cd   :  { %1808 = vrot.lane.b32.xlu0 %v1827_v21, %s2061_s29 }
 0x2ce   :  { %1818 = vrot.lane.b32.xlu1 %v1832_v22, %s2061_s29 }
 0x2d1   :  { %1813 = vrot.lane.b32.xlu0 %v1812_v0, %s2062_s30 }
 0x2d2   :  { %1823 = vrot.lane.b32.xlu1 %v1822_v4, %s2062_s30 }
 0x2d5   :  { %1828 = vrot.lane.b32.xlu0 %v1827_v21, %s2062_s30 }
 0x2d6   :  { %1833 = vrot.lane.b32.xlu1 %v1832_v22, %s2062_s30  ;;  %v2021_v22 = vld [vmem:[%s2769_s3 + $0x10] sm:$0xff]  }
 0x2d9   :  { %445 = vperm.xlu0 %1755, %v1539_v23   ;;  %v2022_v23 = vld [vmem:[%s2769_s3 + $0x18] sm:$0xff]  }
 0x2da   :  { %450 = vperm.xlu1 %1756, %v1540_v24  }
 0x2dd   :  { %455 = vperm.xlu0 %1755, %v1541_v25  }
 0x2de   :  { %460 = vperm.xlu1 %1756, %v1542_v26  }
 0x337   :  { %v1799_v27 = vpop.permute.xlu0 %1798 }
 0x338   :  { %v1801_v29 = vunpack.i.h.bf16 %v1799_v27  ;;  %v1800_v30 = vunpack.i.l.bf16 %v1799_v27  ;;  %v1804_v31 = vpop.permute.xlu1 %1803 }
 0x339   :  { %v1806_v32 = vunpack.i.h.bf16 %v1804_v31  ;;  %v1805_v33 = vunpack.i.l.bf16 %v1804_v31 }
 0x33b   :  { %v378_v34 = vsel %vm2775_vm14, %v1800_v30, %v1805_v33  ;;  %v379_v35 = vsel %vm2775_vm14, %v1801_v29, %v1806_v32  ;;  %v382_v36 = vsel %vm2775_vm14, %v1805_v33, %v1800_v30  ;;  %v383_v37 = vsel %vm2775_vm14, %v1806_v32, %v1801_v29 }
 0x33c   :  { %v1546_v40 = vpack.c.bf16 %v379_v35, %v378_v34  ;;  %v1549_v41 = vpack.c.bf16 %v383_v37, %v382_v36 }
 0x33e   :  { %1547 = vmatprep.subr.msk.bf16.mxu0 %vm2286_vm2, %v1546_v40 }
 0x33f   :  { %v1809_v43 = vpop.permute.xlu0 %1808  ;;  %1550 = vmatpush1.bf16.msk.msra.mxu0 %vm2290_vm3, %v1549_v41 }
 0x340   :  { %v1811_v44 = vunpack.i.h.bf16 %v1809_v43  ;;  %v1810_v45 = vunpack.i.l.bf16 %v1809_v43  ;;  %v1819_v46 = vpop.permute.xlu1 %1818 }
 0x341   :  { %v1821_v47 = vunpack.i.h.bf16 %v1819_v46  ;;  %v1820_v48 = vunpack.i.l.bf16 %v1819_v46 }
 0x343   :  { %v380_v49 = vsel %vm2775_vm14, %v1810_v45, %v1820_v48  ;;  %v381_v50 = vsel %vm2775_vm14, %v1811_v44, %v1821_v47  ;;  %v384_v51 = vsel %vm2775_vm14, %v1820_v48, %v1810_v45  ;;  %v385_v52 = vsel %vm2775_vm14, %v1821_v47, %v1811_v44  ;;  %v1814_v53 = vpop.permute.xlu0 %1813  ;;  %vm2395_vm14 = vmpackc.low %vm43_vm5, %vm43_vm5 }
 0x344   :  { %v1552_v54 = vpack.c.bf16 %v381_v50, %v380_v49  ;;  %v1555_v55 = vpack.c.bf16 %v385_v52, %v384_v51  ;;  %v1816_v56 = vunpack.i.h.bf16 %v1814_v53  ;;  %v1815_v57 = vunpack.i.l.bf16 %v1814_v53  ;;  %v1824_v58 = vpop.permute.xlu1 %1823  ;;  %vm2428_vm5 = vmpackc.low %vm46_vm7, %vm46_vm7 }
 0x345   :  { %v1826_v59 = vunpack.i.h.bf16 %v1824_v58  ;;  %v1825_v60 = vunpack.i.l.bf16 %v1824_v58  ;;  %vm2805_vm7 = vcmp.lt.s32.totalorder %v2129_v9, 1 }
 0x346   :  { %1553 = vmatprep.subr.msk.bf16.mxu0 %vm2286_vm2, %v1552_v54 }
 0x347   :  { %v415_v61 = vsel %vm2774_vm4, %v1815_v57, %v1825_v60  ;;  %v416_v62 = vsel %vm2774_vm4, %v1816_v56, %v1826_v59  ;;  %v419_v63 = vsel %vm2774_vm4, %v1825_v60, %v1815_v57  ;;  %v420_v0 = vsel %vm2774_vm4, %v1826_v59, %v1816_v56  ;;  %v1829_v2 = vpop.permute.xlu0 %1828  ;;  %1556 = vmatpush1.bf16.msk.msra.mxu0 %vm2290_vm3, %v1555_v55  ;;  %v1575_v60 = vld [vmem:[%s2770_s4 + $0x40] sm:$0xff] }
 0x348   :  { %v1558_v5 = vpack.c.bf16 %v420_v0, %v419_v63  ;;  %v1561_v7 = vpack.c.bf16 %v416_v62, %v415_v61  ;;  %v1831_v8 = vunpack.i.h.bf16 %v1829_v2  ;;  %v1830_v10 = vunpack.i.l.bf16 %v1829_v2  ;;  %v1834_v12 = vpop.permute.xlu1 %1833  ;;  %v1576_v61 = vld [vmem:[%s2770_s4 + $0x48] sm:$0xff]  ;;  %v1577_v62 = vld [vmem:[%s2770_s4 + $0x50] sm:$0xff]  ;;  %v1578_v63 = vld [vmem:[%s2770_s4 + $0x58] sm:$0xff] }
 0x349   :  { %v1836_v14 = vunpack.i.h.bf16 %v1834_v12  ;;  %v1835_v15 = vunpack.i.l.bf16 %v1834_v12 }
 0x34a   :  { %1559 = vmatprep.subr.msk.bf16.mxu0 %vm2323_vm6, %v1558_v5 }
 0x34b   :  { %v417_v16 = vsel %vm2774_vm4, %v1830_v10, %v1835_v15  ;;  %v418_v17 = vsel %vm2774_vm4, %v1831_v8, %v1836_v14  ;;  %v421_v18 = vsel %vm2774_vm4, %v1835_v15, %v1830_v10  ;;  %v422_v19 = vsel %vm2774_vm4, %v1836_v14, %v1831_v8  ;;  %1562 = vmatpush1.bf16.msk.msra.mxu0 %vm2330_vm8, %v1561_v7  ;;  %vm2391_vm4 = vmpackc.low %vm44_vm1, %vm44_vm1 }
 0x34c   :  { %v1564_v20 = vpack.c.bf16 %v422_v19, %v421_v18  ;;  %v1567_v21 = vpack.c.bf16 %v418_v17, %v417_v16  ;;  %vm2778_vm1 = vcmp.lt.s32.totalorder %v2129_v9, 124 }
 0x34e   :  { %1565 = vmatprep.subr.msk.bf16.mxu0 %vm2323_vm6, %v1564_v20 }
 0x34f   :  { %1568 = vmatpush1.bf16.msk.msra.mxu0 %vm2330_vm8, %v1567_v21 }
 0x352   :  { %1569 = vmatmul.mubr.msk.bf16.vlgmr.msra.gmra.mrb[8].mxu0 %vm2779_vm13, %v2021_v22 }
 0x353   :  { %521 = vmatprep.mubr.bf16.mxu0 %v2057_v3 }
 0x358   :  { %v446_v24 = vpop.permute.xlu0 %445 }
 0x359   :  { %v451_v29 = vpop.permute.xlu1 %450 }
 0x35a   :  { %1570 = vmatmul.mubr.msk.bf16.gmra.mrb[12].mxu0 %vm2779_vm13, %v2022_v23 }
 0x35b   :  { %847 = vmatprep.mubr.bf16.mxu0 %v2057_v3 }
 0x35c   :  { %v456_v43 = vpop.permute.xlu0 %455 }
 0x35d   :  { %v461_v48 = vpop.permute.xlu1 %460 }
 0x425   :  { %v513_v25 = vpop.f32.mrb[8].mxu0 }
 0x426   :  { %v514_v26 = vadd.f32 %v513_v25, %v446_v24  ;;  %v515_v27 = vpop.f32.mrb[9].mxu0 }
 0x427   :  { %v516_v30 = vadd.f32 %v515_v27, %v446_v24  ;;  %v517_v31 = vpop.f32.mrb[10].mxu0 }
 0x428   :  { %v518_v32 = vadd.f32 %v517_v31, %v451_v29  ;;  %v519_v33 = vpop.f32.mrb[11].mxu0  ;;  %v532_v35 = vmax.f32 %v514_v26, 0.0 }
 0x429   :  { %v520_v34 = vadd.f32 %v519_v33, %v451_v29  ;;  %v533_v37 = vmax.f32 %v516_v30, 0.0 }
 0x42a   :  { %v534_v36 = vmax.f32 %v518_v32, 0.0 }
 0x42b   :  { %v535_v40 = vmax.f32 %v520_v34, 0.0 }
 0x42c   :  { %v1852_v41 = vpack.i.bf16 %v534_v36, %v532_v35 }
 0x42d   :  { %v1862_v44 = vpack.i.bf16 %v535_v40, %v533_v37  ;;  %v523_v45 = vpop.f32.mrb[12].mxu0 }
 0x42e   :  { %v524_v46 = vadd.f32 %v523_v45, %v456_v43  ;;  %v525_v47 = vpop.f32.mrb[13].mxu0  ;;  %1838 = vrot.lane.b32.xlu0 %v1852_v41, %s2063_s18 }
 0x42f   :  { %v526_v49 = vadd.f32 %v525_v47, %v456_v43  ;;  %v527_v50 = vpop.f32.mrb[14].mxu0  ;;  %1843 = vrot.lane.b32.xlu1 %v1862_v44, %s2063_s18 }
 0x430   :  { %v528_v51 = vadd.f32 %v527_v50, %v461_v48  ;;  %v529_v52 = vpop.f32.mrb[15].mxu0  ;;  %v536_v54 = vmax.f32 %v524_v46, 0.0 }
 0x431   :  { %v530_v53 = vadd.f32 %v529_v52, %v461_v48  ;;  %v537_v56 = vmax.f32 %v526_v49, 0.0 }
 0x432   :  { %v538_v55 = vmax.f32 %v528_v51, 0.0 }
 0x433   :  { %v539_v57 = vmax.f32 %v530_v53, 0.0 }
 0x434   :  { %v1867_v58 = vpack.i.bf16 %v538_v55, %v536_v54 }
 0x435   :  { %v1872_v59 = vpack.i.bf16 %v539_v57, %v537_v56 }
 0x436   :  { %1848 = vrot.lane.b32.xlu0 %v1867_v58, %s2063_s18 }
 0x437   :  { %1858 = vrot.lane.b32.xlu1 %v1872_v59, %s2063_s18 }
 0x43a   :  { %1853 = vrot.lane.b32.xlu0 %v1852_v41, %s2064_s19 }
 0x43b   :  { %1863 = vrot.lane.b32.xlu1 %v1862_v44, %s2064_s19 }
 0x43e   :  { %1868 = vrot.lane.b32.xlu0 %v1867_v58, %s2064_s19 }
 0x43f   :  { %1873 = vrot.lane.b32.xlu1 %v1872_v59, %s2064_s19 }
 0x442   :  { %634 = vperm.xlu0 %1755, %v1575_v60  }
 0x443   :  { %639 = vperm.xlu1 %1756, %v1576_v61  }
 0x446   :  { %644 = vperm.xlu0 %1755, %v1577_v62   ;;  %v2023_v62 = vld [vmem:[%s2769_s3 + $0x20] sm:$0xff]  }
 0x447   :  { %649 = vperm.xlu1 %1756, %v1578_v63   ;;  %v2024_v63 = vld [vmem:[%s2769_s3 + $0x28] sm:$0xff]  }
 0x4a0   :  { %v1839_v0 = vpop.permute.xlu0 %1838 }
 0x4a1   :  { %v1841_v2 = vunpack.i.h.bf16 %v1839_v0  ;;  %v1840_v5 = vunpack.i.l.bf16 %v1839_v0  ;;  %v1844_v7 = vpop.permute.xlu1 %1843 }
 0x4a2   :  { %v1846_v8 = vunpack.i.h.bf16 %v1844_v7  ;;  %v1845_v10 = vunpack.i.l.bf16 %v1844_v7 }
 0x4a4   :  { %v567_v12 = vsel %vm2777_vm15, %v1840_v5, %v1845_v10  ;;  %v568_v14 = vsel %vm2777_vm15, %v1841_v2, %v1846_v8  ;;  %v571_v15 = vsel %vm2777_vm15, %v1845_v10, %v1840_v5  ;;  %v572_v16 = vsel %vm2777_vm15, %v1846_v8, %v1841_v2 }
 0x4a5   :  { %v1582_v18 = vpack.c.bf16 %v568_v14, %v567_v12  ;;  %v1585_v19 = vpack.c.bf16 %v572_v16, %v571_v15 }
 0x4a7   :  { %1583 = vmatprep.subr.msk.bf16.mxu1 %vm2391_vm4, %v1582_v18 }
 0x4a8   :  { %v1849_v21 = vpop.permute.xlu0 %1848  ;;  %1586 = vmatpush1.bf16.msk.msra.mxu1 %vm2395_vm14, %v1585_v19 }
 0x4a9   :  { %v1851_v22 = vunpack.i.h.bf16 %v1849_v21  ;;  %v1850_v23 = vunpack.i.l.bf16 %v1849_v21  ;;  %v1859_v24 = vpop.permute.xlu1 %1858 }
 0x4aa   :  { %v1861_v25 = vunpack.i.h.bf16 %v1859_v24  ;;  %v1860_v26 = vunpack.i.l.bf16 %v1859_v24 }
 0x4ac   :  { %v569_v27 = vsel %vm2777_vm15, %v1850_v23, %v1860_v26  ;;  %v570_v29 = vsel %vm2777_vm15, %v1851_v22, %v1861_v25  ;;  %v573_v30 = vsel %vm2777_vm15, %v1860_v26, %v1850_v23  ;;  %v574_v31 = vsel %vm2777_vm15, %v1861_v25, %v1851_v22  ;;  %v1854_v32 = vpop.permute.xlu0 %1853  ;;  %vm2435_vm15 = vmpackc.low %vm2778_vm1, %vm2778_vm1 }
 0x4ad   :  { %v1588_v33 = vpack.c.bf16 %v570_v29, %v569_v27  ;;  %v1591_v34 = vpack.c.bf16 %v574_v31, %v573_v30  ;;  %v1856_v35 = vunpack.i.h.bf16 %v1854_v32  ;;  %v1855_v36 = vunpack.i.l.bf16 %v1854_v32  ;;  %v1864_v37 = vpop.permute.xlu1 %1863 }
 0x4ae   :  { %v1866_v40 = vunpack.i.h.bf16 %v1864_v37  ;;  %v1865_v41 = vunpack.i.l.bf16 %v1864_v37 }
 0x4af   :  { %1589 = vmatprep.subr.msk.bf16.mxu1 %vm2391_vm4, %v1588_v33 }
 0x4b0   :  { %v604_v43 = vsel %vm2778_vm1, %v1855_v36, %v1865_v41  ;;  %v605_v44 = vsel %vm2778_vm1, %v1856_v35, %v1866_v40  ;;  %v608_v45 = vsel %vm2778_vm1, %v1865_v41, %v1855_v36  ;;  %v609_v46 = vsel %vm2778_vm1, %v1866_v40, %v1856_v35  ;;  %v1869_v47 = vpop.permute.xlu0 %1868  ;;  %1592 = vmatpush1.bf16.msk.msra.mxu1 %vm2395_vm14, %v1591_v34 }
 0x4b1   :  { %v1594_v49 = vpack.c.bf16 %v609_v46, %v608_v45  ;;  %v1597_v50 = vpack.c.bf16 %v605_v44, %v604_v43  ;;  %v1871_v51 = vunpack.i.h.bf16 %v1869_v47  ;;  %v1870_v52 = vunpack.i.l.bf16 %v1869_v47  ;;  %v1874_v53 = vpop.permute.xlu1 %1873 }
 0x4b2   :  { %v1876_v55 = vunpack.i.h.bf16 %v1874_v53  ;;  %v1875_v56 = vunpack.i.l.bf16 %v1874_v53  ;;  %v1614_v53 = vld [vmem:[%s2770_s4 + $0x78] sm:$0xff] }
 0x4b3   :  { %1595 = vmatprep.subr.msk.bf16.mxu1 %vm2428_vm5, %v1594_v49 }
 0x4b4   :  { %v606_v11 = vsel %vm2778_vm1, %v1870_v52, %v1875_v56  ;;  %v607_v57 = vsel %vm2778_vm1, %v1871_v51, %v1876_v55  ;;  %v610_v58 = vsel %vm2778_vm1, %v1875_v56, %v1870_v52  ;;  %v611_v59 = vsel %vm2778_vm1, %v1876_v55, %v1871_v51  ;;  %1598 = vmatpush1.bf16.msk.msra.mxu1 %vm2435_vm15, %v1597_v50  ;;  %v1611_v50 = vld [vmem:[%s2770_s4 + $0x60] sm:$0xff]  ;;  %v1612_v51 = vld [vmem:[%s2770_s4 + $0x68] sm:$0xff]  ;;  %v1613_v52 = vld [vmem:[%s2770_s4 + $0x70] sm:$0xff] }
 0x4b5   :  { %v1600_v60 = vpack.c.bf16 %v611_v59, %v610_v58  ;;  %v1603_v61 = vpack.c.bf16 %v607_v57, %v606_v11  ;;  %vm2806_vm1 = vmmov %vm2805_vm7 }
 0x4b7   :  { %1601 = vmatprep.subr.msk.bf16.mxu1 %vm2428_vm5, %v1600_v60 }
 0x4b8   :  { %1604 = vmatpush1.bf16.msk.msra.mxu1 %vm2435_vm15, %v1603_v61 }
 0x4bb   :  { %1605 = vmatmul.mubr.msk.bf16.vlgmr.msra.gmra.mrb[8].mxu1 %vm2779_vm13, %v2023_v62 }
 0x4bc   :  { %710 = vmatprep.mubr.bf16.mxu1 %v2057_v3 }
 0x4c1   :  { %v635_v0 = vpop.permute.xlu0 %634 }
 0x4c2   :  { %v640_v8 = vpop.permute.xlu1 %639 }
 0x4c3   :  { %1606 = vmatmul.mubr.msk.bf16.gmra.mrb[12].mxu1 %vm2779_vm13, %v2024_v63 }
 0x4c4   :  { %1026 = vmatprep.mubr.bf16.mxu1 %v2057_v3 }
 0x4c5   :  { %v645_v25 = vpop.permute.xlu0 %644 }
 0x4c6   :  { %v650_v32 = vpop.permute.xlu1 %649 }
 0x58e   :  { %v702_v2 = vpop.f32.mrb[8].mxu1 }
 0x58f   :  { %v703_v5 = vadd.f32 %v702_v2, %v635_v0  ;;  %v704_v7 = vpop.f32.mrb[9].mxu1 }
 0x590   :  { %v705_v10 = vadd.f32 %v704_v7, %v635_v0  ;;  %v706_v12 = vpop.f32.mrb[10].mxu1 }
 0x591   :  { %v707_v14 = vadd.f32 %v706_v12, %v640_v8  ;;  %v708_v15 = vpop.f32.mrb[11].mxu1  ;;  %v721_v18 = vmax.f32 %v703_v5, 0.0 }
 0x592   :  { %v709_v16 = vadd.f32 %v708_v15, %v640_v8  ;;  %v722_v21 = vmax.f32 %v705_v10, 0.0 }
 0x593   :  { %v723_v19 = vmax.f32 %v707_v14, 0.0 }
 0x594   :  { %v724_v22 = vmax.f32 %v709_v16, 0.0 }
 0x595   :  { %v1877_v23 = vpack.i.bf16 %v723_v19, %v721_v18  ;;  %v771_v24 = vpack.c.bf16 %v723_v19, %v721_v18 }
 0x596   :  { %v1882_v26 = vpack.i.bf16 %v724_v22, %v722_v21  ;;  %v772_v27 = vpack.c.bf16 %v724_v22, %v722_v21  ;;  %v712_v29 = vpop.f32.mrb[12].mxu1 }
 0x597   :  { %v713_v30 = vadd.f32 %v712_v29, %v645_v25  ;;  %v714_v31 = vpop.f32.mrb[13].mxu1  ;;  %1878 = vrot.lane.b32.xlu0 %v1877_v23, %s2058_s28  ;;  %v2025_v23 = vld [vmem:[%s2769_s3 + $0x30] sm:$0xff]  }
 0x598   :  { %v715_v33 = vadd.f32 %v714_v31, %v645_v25  ;;  %v716_v34 = vpop.f32.mrb[14].mxu1  ;;  %1883 = vrot.lane.b32.xlu1 %v1882_v26, %s2058_s28  ;;  %815 = vmatprep.subr.bf16.mxu0 %v772_v27 }
 0x599   :  { %v717_v35 = vadd.f32 %v716_v34, %v650_v32  ;;  %v718_v36 = vpop.f32.mrb[15].mxu1  ;;  %816 = vmatpush1.bf16.msra.mxu0 %v771_v24  ;;  %v725_v40 = vmax.f32 %v713_v30, 0.0  ;;  %v2026_v24 = vld [vmem:[%s2769_s3 + $0x38] sm:$0xff]  }
 0x59a   :  { %v719_v37 = vadd.f32 %v718_v36, %v650_v32  ;;  %v726_v43 = vmax.f32 %v715_v33, 0.0 }
 0x59b   :  { %v727_v41 = vmax.f32 %v717_v35, 0.0 }
 0x59c   :  { %v728_v44 = vmax.f32 %v719_v37, 0.0 }
 0x59d   :  { %v1887_v45 = vpack.i.bf16 %v727_v41, %v725_v40  ;;  %v773_v46 = vpack.c.bf16 %v727_v41, %v725_v40 }
 0x59e   :  { %v1892_v47 = vpack.i.bf16 %v728_v44, %v726_v43  ;;  %v774_v49 = vpack.c.bf16 %v728_v44, %v726_v43 }
 0x59f   :  { %1888 = vrot.lane.b32.xlu0 %v1887_v45, %s2058_s28 }
 0x5a0   :  { %1893 = vrot.lane.b32.xlu1 %v1892_v47, %s2058_s28  ;;  %817 = vmatprep.subr.bf16.mxu0 %v774_v49 }
 0x5a1   :  { %818 = vmatpush1.bf16.msra.mxu0 %v773_v46 }
 0x5a3   :  { %781 = vperm.xlu0 %1755, %v1611_v50  }
 0x5a4   :  { %786 = vperm.xlu1 %1756, %v1612_v51  }
 0x5a7   :  { %791 = vperm.xlu0 %1755, %v1613_v52  }
 0x5a8   :  { %796 = vperm.xlu1 %1756, %v1614_v53  }
 0x609   :  { %v1879_v55 = vpop.permute.xlu0 %1878 }
 0x60a   :  { %v1881_v56 = vunpack.i.h.bf16 %v1879_v55  ;;  %v1880_v11 = vunpack.i.l.bf16 %v1879_v55  ;;  %v1884_v57 = vpop.permute.xlu1 %1883 }
 0x60b   :  { %v1886_v58 = vunpack.i.h.bf16 %v1884_v57  ;;  %v1885_v59 = vunpack.i.l.bf16 %v1884_v57 }
 0x60d   :  { %v755_v60 = vsel %vm2780_vm0, %v1880_v11, %v1885_v59  ;;  %v756_v61 = vsel %vm2780_vm0, %v1881_v56, %v1886_v58  ;;  %v759_v62 = vsel %vm2780_vm0, %v1885_v59, %v1880_v11  ;;  %v760_v63 = vsel %vm2780_vm0, %v1886_v58, %v1881_v56 }
 0x60e   :  { %v1618_v0 = vpack.c.bf16 %v760_v63, %v759_v62  ;;  %v1621_v2 = vpack.c.bf16 %v756_v61, %v755_v60  ;;  %v1635_v62 = vld [vmem:[%s2770_s4 + $0x80] sm:$0xff]  ;;  %v1636_v63 = vld [vmem:[%s2770_s4 + $0x88] sm:$0xff] }
 0x610   :  { %1619 = vmatprep.subr.msk.bf16.mxu0 %vm2208_vm11, %v1618_v0  ;;  %v1637_v0 = vld [vmem:[%s2770_s4 + $0x90] sm:$0xff] }
 0x611   :  { %v1889_v5 = vpop.permute.xlu0 %1888  ;;  %1622 = vmatpush1.bf16.msk.msra.mxu0 %vm2225_vm12, %v1621_v2  ;;  %v1638_v2 = vld [vmem:[%s2770_s4 + $0x98] sm:$0xff] }
 0x612   :  { %v1891_v7 = vunpack.i.h.bf16 %v1889_v5  ;;  %v1890_v8 = vunpack.i.l.bf16 %v1889_v5  ;;  %v1894_v10 = vpop.permute.xlu1 %1893 }
 0x613   :  { %v1896_v12 = vunpack.i.h.bf16 %v1894_v10  ;;  %v1895_v14 = vunpack.i.l.bf16 %v1894_v10 }
 0x615   :  { %v757_v15 = vsel %vm2780_vm0, %v1890_v8, %v1895_v14  ;;  %v758_v16 = vsel %vm2780_vm0, %v1891_v7, %v1896_v12  ;;  %v761_v18 = vsel %vm2780_vm0, %v1895_v14, %v1890_v8  ;;  %v762_v19 = vsel %vm2780_vm0, %v1896_v12, %v1891_v7  ;;  %vm2808_vm0 = vmmov %vm2806_vm1 }
 0x616   :  { %v1624_v21 = vpack.c.bf16 %v762_v19, %v761_v18  ;;  %v1627_v22 = vpack.c.bf16 %v758_v16, %v757_v15 }
 0x618   :  { %1625 = vmatprep.subr.msk.bf16.mxu0 %vm2208_vm11, %v1624_v21 }
 0x619   :  { %1628 = vmatpush1.bf16.msk.msra.mxu0 %vm2225_vm12, %v1627_v22 }
 0x61c   :  { %1629 = vmatmul.mubr.msk.bf16.vlgmr.msra.gmra.mrb[16].mxu0 %vm2779_vm13, %v2025_v23 }
 0x61d   :  { %857 = vmatprep.mubr.bf16.mxu0 %v2057_v3 }
 0x622   :  { %v782_v25 = vpop.permute.xlu0 %781 }
 0x623   :  { %v787_v30 = vpop.permute.xlu1 %786 }
 0x624   :  { %1630 = vmatmul.mubr.msk.bf16.gmra.mrb[20].mxu0 %vm2779_vm13, %v2026_v24  ;;  %vm2807_vm13 = vmmov %vm2806_vm1 }
 0x625   :  { %1205 = vmatprep.mubr.bf16.mxu0 %v2057_v3 }
 0x626   :  { %v792_v44 = vpop.permute.xlu0 %791 }
 0x627   :  { %v797_v50 = vpop.permute.xlu1 %796 }
 0x6ef   :  { %v849_v26 = vpop.f32.mrb[16].mxu0 }
 0x6f0   :  { %v850_v27 = vadd.f32 %v849_v26, %v782_v25  ;;  %v851_v29 = vpop.f32.mrb[17].mxu0 }
 0x6f1   :  { %v852_v31 = vadd.f32 %v851_v29, %v782_v25  ;;  %v853_v32 = vpop.f32.mrb[18].mxu0 }
 0x6f2   :  { %v854_v33 = vadd.f32 %v853_v32, %v787_v30  ;;  %v855_v34 = vpop.f32.mrb[19].mxu0  ;;  %v868_v36 = vmax.f32 %v850_v27, 0.0 }
 0x6f3   :  { %v856_v35 = vadd.f32 %v855_v34, %v787_v30  ;;  %v869_v40 = vmax.f32 %v852_v31, 0.0 }
 0x6f4   :  { %v870_v37 = vmax.f32 %v854_v33, 0.0 }
 0x6f5   :  { %v871_v41 = vmax.f32 %v856_v35, 0.0 }
 0x6f6   :  { %v1912_v43 = vpack.i.bf16 %v870_v37, %v868_v36 }
 0x6f7   :  { %v1922_v45 = vpack.i.bf16 %v871_v41, %v869_v40  ;;  %v859_v46 = vpop.f32.mrb[20].mxu0 }
 0x6f8   :  { %v860_v47 = vadd.f32 %v859_v46, %v792_v44  ;;  %v861_v49 = vpop.f32.mrb[21].mxu0  ;;  %1898 = vrot.lane.b32.xlu0 %v1912_v43, %s2060_s1 }
 0x6f9   :  { %v862_v51 = vadd.f32 %v861_v49, %v792_v44  ;;  %v863_v52 = vpop.f32.mrb[22].mxu0  ;;  %1903 = vrot.lane.b32.xlu1 %v1922_v45, %s2060_s1 }
 0x6fa   :  { %v864_v53 = vadd.f32 %v863_v52, %v797_v50  ;;  %v865_v55 = vpop.f32.mrb[23].mxu0  ;;  %v872_v11 = vmax.f32 %v860_v47, 0.0 }
 0x6fb   :  { %v866_v56 = vadd.f32 %v865_v55, %v797_v50  ;;  %v873_v58 = vmax.f32 %v862_v51, 0.0 }
 0x6fc   :  { %v874_v57 = vmax.f32 %v864_v53, 0.0 }
 0x6fd   :  { %v875_v59 = vmax.f32 %v866_v56, 0.0 }
 0x6fe   :  { %v1927_v60 = vpack.i.bf16 %v874_v57, %v872_v11 }
 0x6ff   :  { %v1932_v61 = vpack.i.bf16 %v875_v59, %v873_v58 }
 0x700   :  { %1908 = vrot.lane.b32.xlu0 %v1927_v60, %s2060_s1 }
 0x701   :  { %1918 = vrot.lane.b32.xlu1 %v1932_v61, %s2060_s1 }
 0x704   :  { %1913 = vrot.lane.b32.xlu0 %v1912_v43, %s2058_s28 }
 0x705   :  { %1923 = vrot.lane.b32.xlu1 %v1922_v45, %s2058_s28 }
 0x708   :  { %1928 = vrot.lane.b32.xlu0 %v1927_v60, %s2058_s28 }
 0x709   :  { %1933 = vrot.lane.b32.xlu1 %v1932_v61, %s2058_s28 }
 0x70c   :  { %960 = vperm.xlu0 %1755, %v1635_v62   ;;  %v2027_v62 = vld [vmem:[%s2769_s3 + $0x40] sm:$0xff]  }
 0x70d   :  { %965 = vperm.xlu1 %1756, %v1636_v63   ;;  %v2028_v63 = vld [vmem:[%s2769_s3 + $0x48] sm:$0xff]  }
 0x710   :  { %970 = vperm.xlu0 %1755, %v1637_v0  }
 0x711   :  { %975 = vperm.xlu1 %1756, %v1638_v2  }
 0x76a   :  { %v1899_v5 = vpop.permute.xlu0 %1898 }
 0x76b   :  { %v1901_v7 = vunpack.i.h.bf16 %v1899_v5  ;;  %v1900_v8 = vunpack.i.l.bf16 %v1899_v5  ;;  %v1904_v10 = vpop.permute.xlu1 %1903 }
 0x76c   :  { %v1906_v12 = vunpack.i.h.bf16 %v1904_v10  ;;  %v1905_v14 = vunpack.i.l.bf16 %v1904_v10 }
 0x76e   :  { %v902_v15 = vsel %vm2805_vm7, %v1900_v8, %v1905_v14  ;;  %v903_v16 = vsel %vm2806_vm1, %v1901_v7, %v1906_v12  ;;  %v906_v18 = vsel %vm2807_vm13, %v1905_v14, %v1900_v8  ;;  %v907_v19 = vsel %vm2808_vm0, %v1906_v12, %v1901_v7  ;;  %vm2809_vm1 = vmmov %vm2808_vm0 }
 0x76f   :  { %v1642_v21 = vpack.c.bf16 %v903_v16, %v902_v15  ;;  %v1645_v22 = vpack.c.bf16 %v907_v19, %v906_v18  ;;  %vm2810_vm13 = vmmov %vm2808_vm0 }
 0x770   :  { %vm2811_vm7 = vmmov %vm2808_vm0 }
 0x771   :  { %1643 = vmatprep.subr.msk.bf16.mxu1 %vm2179_vm9, %v1642_v21 }
 0x772   :  { %v1909_v23 = vpop.permute.xlu0 %1908  ;;  %1646 = vmatpush1.bf16.msk.msra.mxu1 %vm2187_vm10, %v1645_v22 }
 0x773   :  { %v1911_v24 = vunpack.i.h.bf16 %v1909_v23  ;;  %v1910_v25 = vunpack.i.l.bf16 %v1909_v23  ;;  %v1919_v26 = vpop.permute.xlu1 %1918 }
 0x774   :  { %v1921_v27 = vunpack.i.h.bf16 %v1919_v26  ;;  %v1920_v29 = vunpack.i.l.bf16 %v1919_v26 }
 0x776   :  { %v904_v30 = vsel %vm2809_vm1, %v1910_v25, %v1920_v29  ;;  %v905_v31 = vsel %vm2810_vm13, %v1911_v24, %v1921_v27  ;;  %v908_v32 = vsel %vm2808_vm0, %v1920_v29, %v1910_v25  ;;  %v909_v33 = vsel %vm2811_vm7, %v1921_v27, %v1911_v24  ;;  %v1914_v34 = vpop.permute.xlu0 %1913 }
 0x777   :  { %v1648_v35 = vpack.c.bf16 %v905_v31, %v904_v30  ;;  %v1651_v36 = vpack.c.bf16 %v909_v33, %v908_v32  ;;  %v1916_v37 = vunpack.i.h.bf16 %v1914_v34  ;;  %v1915_v40 = vunpack.i.l.bf16 %v1914_v34  ;;  %v1924_v41 = vpop.permute.xlu1 %1923 }
 0x778   :  { %v1926_v43 = vunpack.i.h.bf16 %v1924_v41  ;;  %v1925_v44 = vunpack.i.l.bf16 %v1924_v41  ;;  %vm2812_vm1 = vcmp.lt.s32.totalorder %v2129_v9, 127 }
 0x779   :  { %1649 = vmatprep.subr.msk.bf16.mxu1 %vm2179_vm9, %v1648_v35  ;;  %vm2813_vm13 = vmmov %vm2812_vm1 }
 0x77a   :  { %v934_v45 = vsel %vm2812_vm1, %v1915_v40, %v1925_v44  ;;  %v935_v46 = vsel %vm2813_vm13, %v1916_v37, %v1926_v43  ;;  %vm2814_vm0 = vmmov %vm2812_vm1  ;;  %v1929_v50 = vpop.permute.xlu0 %1928  ;;  %1652 = vmatpush1.bf16.msk.msra.mxu1 %vm2187_vm10, %v1651_v36 }
 0x77b   :  { %v938_v47 = vsel %vm2814_vm0, %v1925_v44, %v1915_v40  ;;  %vm2815_vm7 = vmmov %vm2814_vm0  ;;  %v1657_v52 = vpack.c.bf16 %v935_v46, %v934_v45  ;;  %v1931_v1 = vunpack.i.h.bf16 %v1929_v50  ;;  %v1930_v53 = vunpack.i.l.bf16 %v1929_v50  ;;  %v1934_v55 = vpop.permute.xlu1 %1933  ;;  %v1672_v44 = vld [vmem:[%s2770_s4 + $0xa8] sm:$0xff]  ;;  %v1673_v45 = vld [vmem:[%s2770_s4 + $0xb0] sm:$0xff] }
 0x77c   :  { %v939_v49 = vsel %vm2815_vm7, %v1926_v43, %v1916_v37  ;;  %v1936_v56 = vunpack.i.h.bf16 %v1934_v55  ;;  %v1935_v11 = vunpack.i.l.bf16 %v1934_v55  ;;  %vm2816_vm9 = vmmov %vm2814_vm0  ;;  %v1671_v43 = vld [vmem:[%s2770_s4 + $0xa0] sm:$0xff]  ;;  %v1674_v46 = vld [vmem:[%s2770_s4 + $0xb8] sm:$0xff] }
 0x77d   :  { %v1654_v51 = vpack.c.bf16 %v939_v49, %v938_v47  ;;  %vm2817_vm1 = vmmov %vm2814_vm0 }
 0x77e   :  { %v936_v57 = vsel %vm2816_vm9, %v1930_v53, %v1935_v11  ;;  %v937_v58 = vsel %vm2817_vm1, %v1931_v1, %v1936_v56  ;;  %vm2818_vm13 = vmmov %vm2814_vm0 }
 0x77f   :  { %1655 = vmatprep.subr.msk.bf16.mxu1 %vm2208_vm11, %v1654_v51  ;;  %v940_v6 = vsel %vm2818_vm13, %v1935_v11, %v1930_v53  ;;  %vm2819_vm10 = vmmov %vm2814_vm0  ;;  %v1663_v61 = vpack.c.bf16 %v937_v58, %v936_v57  ;;  %vm2820_vm0 = vcmask 523264  }
 0x780   :  { %v941_v59 = vsel %vm2819_vm10, %v1936_v56, %v1931_v1  ;;  %1658 = vmatpush1.bf16.msk.msra.mxu1 %vm2225_vm12, %v1657_v52  ;;  %vm2821_vm7 = vmmov %vm2820_vm0 }
 0x781   :  { %v1660_v60 = vpack.c.bf16 %v941_v59, %v940_v6 }
 0x783   :  { %1661 = vmatprep.subr.msk.bf16.mxu1 %vm2208_vm11, %v1660_v60  ;;  %vm2822_vm11 = vcmp.lt.s32.totalorder %v2129_v9, 2 }
 0x784   :  { %1664 = vmatpush1.bf16.msk.msra.mxu1 %vm2225_vm12, %v1663_v61  ;;  %vm2823_vm12 = vmmov %vm2822_vm11 }
 0x785   :  { %vm2824_vm9 = vmmov %vm2822_vm11 }
 0x786   :  { %vm2825_vm1 = vmmov %vm2824_vm9 }
 0x787   :  { %1665 = vmatmul.mubr.msk.bf16.vlgmr.msra.gmra.mrb[16].mxu1 %vm2820_vm0, %v2027_v62  ;;  %vm2826_vm13 = vmmov %vm2825_vm1 }
 0x788   :  { %1036 = vmatprep.mubr.bf16.mxu1 %v2057_v3  ;;  %vm2827_vm10 = vmmov %vm2825_vm1 }
 0x789   :  { %vm2828_vm0 = vmmov %vm2825_vm1 }
 0x78b   :  { %v961_v28 = vpop.permute.xlu0 %960 }
 0x78c   :  { %v966_v7 = vpop.permute.xlu1 %965 }
 0x78f   :  { %1666 = vmatmul.mubr.msk.bf16.gmra.mrb[20].mxu1 %vm2821_vm7, %v2028_v63  ;;  %v971_v22 = vpop.permute.xlu0 %970  ;;  %vm2829_vm7 = vmmov %vm2828_vm0 }
 0x790   :  { %1384 = vmatprep.mubr.bf16.mxu1 %v2057_v3  ;;  %v976_v27 = vpop.permute.xlu1 %975 }
 0x85a   :  { %v1028_v0 = vpop.f32.mrb[16].mxu1 }
 0x85b   :  { %v1029_v2 = vadd.f32 %v1028_v0, %v961_v28  ;;  %v1030_v5 = vpop.f32.mrb[17].mxu1 }
 0x85c   :  { %v1031_v8 = vadd.f32 %v1030_v5, %v961_v28  ;;  %v1032_v39 = vpop.f32.mrb[18].mxu1 }
 0x85d   :  { %v1033_v10 = vadd.f32 %v1032_v39, %v966_v7  ;;  %v1034_v12 = vpop.f32.mrb[19].mxu1  ;;  %v1047_v15 = vmax.f32 %v1029_v2, 0.0 }
 0x85e   :  { %v1035_v14 = vadd.f32 %v1034_v12, %v966_v7  ;;  %v1048_v18 = vmax.f32 %v1031_v8, 0.0 }
 0x85f   :  { %v1049_v16 = vmax.f32 %v1033_v10, 0.0 }
 0x860   :  { %v1050_v19 = vmax.f32 %v1035_v14, 0.0 }
 0x861   :  { %v1952_v21 = vpack.i.bf16 %v1049_v16, %v1047_v15 }
 0x862   :  { %v1962_v23 = vpack.i.bf16 %v1050_v19, %v1048_v18  ;;  %v1038_v24 = vpop.f32.mrb[20].mxu1 }
 0x863   :  { %v1039_v25 = vadd.f32 %v1038_v24, %v971_v22  ;;  %v1040_v26 = vpop.f32.mrb[21].mxu1  ;;  %1938 = vrot.lane.b32.xlu0 %v1952_v21, %s2061_s29 }
 0x864   :  { %v1041_v29 = vadd.f32 %v1040_v26, %v971_v22  ;;  %v1042_v30 = vpop.f32.mrb[22].mxu1  ;;  %1943 = vrot.lane.b32.xlu1 %v1962_v23, %s2061_s29 }
 0x865   :  { %v1043_v31 = vadd.f32 %v1042_v30, %v976_v27  ;;  %v1044_v32 = vpop.f32.mrb[23].mxu1  ;;  %v1051_v34 = vmax.f32 %v1039_v25, 0.0 }
 0x866   :  { %v1045_v33 = vadd.f32 %v1044_v32, %v976_v27  ;;  %v1052_v36 = vmax.f32 %v1041_v29, 0.0 }
 0x867   :  { %v1053_v35 = vmax.f32 %v1043_v31, 0.0 }
 0x868   :  { %v1054_v37 = vmax.f32 %v1045_v33, 0.0 }
 0x869   :  { %v1967_v40 = vpack.i.bf16 %v1053_v35, %v1051_v34 }
 0x86a   :  { %v1972_v41 = vpack.i.bf16 %v1054_v37, %v1052_v36  ;;  %v2029_v36 = vld [vmem:[%s2769_s3 + $0x50] sm:$0xff]   ;;  %v2030_v37 = vld [vmem:[%s2769_s3 + $0x58] sm:$0xff]  }
 0x86b   :  { %1948 = vrot.lane.b32.xlu0 %v1967_v40, %s2061_s29 }
 0x86c   :  { %1958 = vrot.lane.b32.xlu1 %v1972_v41, %s2061_s29 }
 0x86f   :  { %1953 = vrot.lane.b32.xlu0 %v1952_v21, %s2062_s30 }
 0x870   :  { %1963 = vrot.lane.b32.xlu1 %v1962_v23, %s2062_s30 }
 0x873   :  { %1968 = vrot.lane.b32.xlu0 %v1967_v40, %s2062_s30 }
 0x874   :  { %1973 = vrot.lane.b32.xlu1 %v1972_v41, %s2062_s30 }
 0x877   :  { %1139 = vperm.xlu0 %1755, %v1671_v43  }
 0x878   :  { %1144 = vperm.xlu1 %1756, %v1672_v44  }
 0x87b   :  { %1149 = vperm.xlu0 %1755, %v1673_v45  }
 0x87c   :  { %1154 = vperm.xlu1 %1756, %v1674_v46  }
 0x8d5   :  { %v1939_v47 = vpop.permute.xlu0 %1938 }
 0x8d6   :  { %v1941_v49 = vunpack.i.h.bf16 %v1939_v47  ;;  %v1940_v50 = vunpack.i.l.bf16 %v1939_v47  ;;  %v1944_v51 = vpop.permute.xlu1 %1943 }
 0x8d7   :  { %v1946_v52 = vunpack.i.h.bf16 %v1944_v51  ;;  %v1945_v1 = vunpack.i.l.bf16 %v1944_v51 }
 0x8d9   :  { %v1081_v53 = vsel %vm2822_vm11, %v1940_v50, %v1945_v1  ;;  %v1082_v55 = vsel %vm2823_vm12, %v1941_v49, %v1946_v52  ;;  %v1085_v56 = vsel %vm2824_vm9, %v1945_v1, %v1940_v50  ;;  %v1086_v11 = vsel %vm2825_vm1, %v1946_v52, %v1941_v49 }
 0x8da   :  { %v1678_v57 = vpack.c.bf16 %v1082_v55, %v1081_v53  ;;  %v1681_v58 = vpack.c.bf16 %v1086_v11, %v1085_v56  ;;  %vm2830_vm11 = vcmp.lt.s32.totalorder %v2129_v9, 126 }
 0x8db   :  { %vm2831_vm12 = vmmov %vm2830_vm11 }
 0x8dc   :  { %1679 = vmatprep.subr.msk.bf16.mxu0 %vm2286_vm2, %v1678_v57  ;;  %vm2832_vm9 = vmmov %vm2830_vm11 }
 0x8dd   :  { %v1949_v6 = vpop.permute.xlu0 %1948  ;;  %1682 = vmatpush1.bf16.msk.msra.mxu0 %vm2290_vm3, %v1681_v58  ;;  %vm2833_vm1 = vmmov %vm2832_vm9 }
 0x8de   :  { %v1951_v59 = vunpack.i.h.bf16 %v1949_v6  ;;  %v1950_v60 = vunpack.i.l.bf16 %v1949_v6  ;;  %v1959_v61 = vpop.permute.xlu1 %1958 }
 0x8df   :  { %v1961_v62 = vunpack.i.h.bf16 %v1959_v61  ;;  %v1960_v63 = vunpack.i.l.bf16 %v1959_v61 }
 0x8e1   :  { %v1083_v28 = vsel %vm2826_vm13, %v1950_v60, %v1960_v63  ;;  %v1084_v0 = vsel %vm2827_vm10, %v1951_v59, %v1961_v62  ;;  %v1087_v2 = vsel %vm2828_vm0, %v1960_v63, %v1950_v60  ;;  %v1088_v5 = vsel %vm2829_vm7, %v1961_v62, %v1951_v59  ;;  %v1954_v7 = vpop.permute.xlu0 %1953  ;;  %vm2835_vm13 = vmmov %vm2833_vm1 }
 0x8e2   :  { %v1684_v8 = vpack.c.bf16 %v1084_v0, %v1083_v28  ;;  %v1687_v39 = vpack.c.bf16 %v1088_v5, %v1087_v2  ;;  %v1956_v10 = vunpack.i.h.bf16 %v1954_v7  ;;  %v1955_v12 = vunpack.i.l.bf16 %v1954_v7  ;;  %v1964_v14 = vpop.permute.xlu1 %1963  ;;  %vm2836_vm10 = vmmov %vm2833_vm1 }
 0x8e3   :  { %v1966_v15 = vunpack.i.h.bf16 %v1964_v14  ;;  %v1965_v16 = vunpack.i.l.bf16 %v1964_v14  ;;  %vm2838_vm0 = vcmask 523264   ;;  %v1710_v14 = vld [vmem:[%s2770_s4 + $0xd8] sm:$0xff] }
 0x8e4   :  { %1685 = vmatprep.subr.msk.bf16.mxu0 %vm2286_vm2, %v1684_v8  ;;  %vm2834_vm2 = vmmov %vm2833_vm1 }
 0x8e5   :  { %v1113_v18 = vsel %vm2830_vm11, %v1955_v12, %v1965_v16  ;;  %v1114_v19 = vsel %vm2831_vm12, %v1956_v10, %v1966_v15  ;;  %v1117_v21 = vsel %vm2832_vm9, %v1965_v16, %v1955_v12  ;;  %v1118_v22 = vsel %vm2833_vm1, %v1966_v15, %v1956_v10  ;;  %v1969_v23 = vpop.permute.xlu0 %1968  ;;  %1688 = vmatpush1.bf16.msk.msra.mxu0 %vm2290_vm3, %v1687_v39  ;;  %vm2837_vm3 = vmmov %vm2833_vm1  ;;  %v1707_v39 = vld [vmem:[%s2770_s4 + $0xc0] sm:$0xff]  ;;  %v1708_v10 = vld [vmem:[%s2770_s4 + $0xc8] sm:$0xff] }
 0x8e6   :  { %v1690_v24 = vpack.c.bf16 %v1118_v22, %v1117_v21  ;;  %v1693_v25 = vpack.c.bf16 %v1114_v19, %v1113_v18  ;;  %v1971_v38 = vunpack.i.h.bf16 %v1969_v23  ;;  %v1970_v26 = vunpack.i.l.bf16 %v1969_v23  ;;  %v1974_v27 = vpop.permute.xlu1 %1973  ;;  %vm2839_vm7 = vmmov %vm2838_vm0  ;;  %v1709_v12 = vld [vmem:[%s2770_s4 + $0xd0] sm:$0xff]  ;;  %v1418_v15 = vld [vmem:[%s2772_s6] sm:$0x3] }
 0x8e7   :  { %v1976_v29 = vunpack.i.h.bf16 %v1974_v27  ;;  %v1975_v30 = vunpack.i.l.bf16 %v1974_v27 }
 0x8e8   :  { %1691 = vmatprep.subr.msk.bf16.mxu0 %vm2323_vm6, %v1690_v24 }
 0x8e9   :  { %v1115_v31 = vsel %vm2834_vm2, %v1970_v26, %v1975_v30  ;;  %v1116_v32 = vsel %vm2835_vm13, %v1971_v38, %v1976_v29  ;;  %v1119_v42 = vsel %vm2836_vm10, %v1975_v30, %v1970_v26  ;;  %v1120_v33 = vsel %vm2837_vm3, %v1976_v29, %v1971_v38  ;;  %1694 = vmatpush1.bf16.msk.msra.mxu0 %vm2330_vm8, %v1693_v25 }
 0x8ea   :  { %v1696_v34 = vpack.c.bf16 %v1120_v33, %v1119_v42  ;;  %v1699_v35 = vpack.c.bf16 %v1116_v32, %v1115_v31  ;;  %vm2848_vm10 = vcmp.lt.s32.totalorder %v2129_v9, 124 }
 0x8eb   :  { %vm2849_vm3 = vmmov %vm2848_vm10 }
 0x8ec   :  { %1697 = vmatprep.subr.msk.bf16.mxu0 %vm2323_vm6, %v1696_v34  ;;  %vm2840_vm6 = vcmp.lt.s32.totalorder %v2129_v9, 4  ;;  %v2032_v9 = vld [vmem:[%s2769_s3 + $0x68] sm:$0xff]  }
 0x8ed   :  { %1700 = vmatpush1.bf16.msk.msra.mxu0 %vm2330_vm8, %v1699_v35  ;;  %vm2841_vm8 = vmmov %vm2840_vm6 }
 0x8ee   :  { %vm2842_vm11 = vmmov %vm2840_vm6 }
 0x8ef   :  { %vm2843_vm12 = vmmov %vm2840_vm6 }
 0x8f0   :  { %1701 = vmatmul.mubr.msk.bf16.vlgmr.msra.gmra.mrb[24].mxu0 %vm2838_vm0, %v2029_v36  ;;  %vm2844_vm9 = vmmov %vm2840_vm6 }
 0x8f1   :  { %1215 = vmatprep.mubr.bf16.mxu0 %v2057_v3  ;;  %vm2845_vm1 = vmmov %vm2840_vm6 }
 0x8f2   :  { %vm2846_vm2 = vmmov %vm2845_vm1 }
 0x8f3   :  { %vm2847_vm13 = vmmov %vm2845_vm1 }
 0x8f4   :  { %vm2850_vm0 = vmmov %vm2849_vm3 }
 0x8f6   :  { %v1140_v4 = vpop.permute.xlu0 %1139 }
 0x8f7   :  { %v1145_v44 = vpop.permute.xlu1 %1144 }
 0x8f8   :  { %1702 = vmatmul.mubr.msk.bf16.gmra.mrb[28].mxu0 %vm2839_vm7, %v2030_v37  ;;  %vm2851_vm7 = vmmov %vm2850_vm0 }
 0x8f9   :  { %1460 = vmatprep.mubr.bf16.mxu0 %v2057_v3 }
 0x8fa   :  { %v1150_v55 = vpop.permute.xlu0 %1149 }
 0x8fb   :  { %v1155_v6 = vpop.permute.xlu1 %1154 }
 0x9c3   :  { %v1207_v40 = vpop.f32.mrb[24].mxu0 }
 0x9c4   :  { %v1208_v41 = vadd.f32 %v1207_v40, %v1140_v4  ;;  %v1209_v43 = vpop.f32.mrb[25].mxu0 }
 0x9c5   :  { %v1210_v45 = vadd.f32 %v1209_v43, %v1140_v4  ;;  %v1211_v13 = vpop.f32.mrb[26].mxu0 }
 0x9c6   :  { %v1212_v46 = vadd.f32 %v1211_v13, %v1145_v44  ;;  %v1213_v47 = vpop.f32.mrb[27].mxu0  ;;  %v1226_v50 = vmax.f32 %v1208_v41, 0.0 }
 0x9c7   :  { %v1214_v49 = vadd.f32 %v1213_v47, %v1145_v44  ;;  %v1227_v52 = vmax.f32 %v1210_v45, 0.0 }
 0x9c8   :  { %v1228_v51 = vmax.f32 %v1212_v46, 0.0 }
 0x9c9   :  { %v1229_v1 = vmax.f32 %v1214_v49, 0.0 }
 0x9ca   :  { %v1992_v53 = vpack.i.bf16 %v1228_v51, %v1226_v50 }
 0x9cb   :  { %v2002_v56 = vpack.i.bf16 %v1229_v1, %v1227_v52  ;;  %v1217_v11 = vpop.f32.mrb[28].mxu0 }
 0x9cc   :  { %v1218_v57 = vadd.f32 %v1217_v11, %v1150_v55  ;;  %v1219_v58 = vpop.f32.mrb[29].mxu0  ;;  %1978 = vrot.lane.b32.xlu0 %v1992_v53, %s2063_s18 }
 0x9cd   :  { %v1220_v59 = vadd.f32 %v1219_v58, %v1150_v55  ;;  %v1221_v60 = vpop.f32.mrb[30].mxu0  ;;  %1983 = vrot.lane.b32.xlu1 %v2002_v56, %s2063_s18 }
 0x9ce   :  { %v1222_v61 = vadd.f32 %v1221_v60, %v1155_v6  ;;  %v1223_v62 = vpop.f32.mrb[31].mxu0  ;;  %v1230_v28 = vmax.f32 %v1218_v57, 0.0 }
 0x9cf   :  { %v1224_v63 = vadd.f32 %v1223_v62, %v1155_v6  ;;  %v1231_v2 = vmax.f32 %v1220_v59, 0.0 }
 0x9d0   :  { %v1232_v0 = vmax.f32 %v1222_v61, 0.0 }
 0x9d1   :  { %v1233_v5 = vmax.f32 %v1224_v63, 0.0  ;;  %v2031_v63 = vld [vmem:[%s2769_s3 + $0x60] sm:$0xff]  }
 0x9d2   :  { %v2007_v7 = vpack.i.bf16 %v1232_v0, %v1230_v28 }
 0x9d3   :  { %v2012_v8 = vpack.i.bf16 %v1233_v5, %v1231_v2 }
 0x9d4   :  { %1988 = vrot.lane.b32.xlu0 %v2007_v7, %s2063_s18 }
 0x9d5   :  { %1998 = vrot.lane.b32.xlu1 %v2012_v8, %s2063_s18 }
 0x9d8   :  { %1993 = vrot.lane.b32.xlu0 %v1992_v53, %s2064_s19 }
 0x9d9   :  { %2003 = vrot.lane.b32.xlu1 %v2002_v56, %s2064_s19 }
 0x9dc   :  { %2008 = vrot.lane.b32.xlu0 %v2007_v7, %s2064_s19 }
 0x9dd   :  { %2013 = vrot.lane.b32.xlu1 %v2012_v8, %s2064_s19 }
 0x9e0   :  { %1318 = vperm.xlu0 %1755, %v1707_v39  }
 0x9e1   :  { %1323 = vperm.xlu1 %1756, %v1708_v10  }
 0x9e4   :  { %1328 = vperm.xlu0 %1755, %v1709_v12  }
 0x9e5   :  { %1333 = vperm.xlu1 %1756, %v1710_v14  }
 0x9e8   :  { %1421 = vperm.xlu0 %1755, %v1418_v15  }
 0xa3e   :  { %v1979_v16 = vpop.permute.xlu0 %1978 }
 0xa3f   :  { %v1981_v18 = vunpack.i.h.bf16 %v1979_v16  ;;  %v1980_v19 = vunpack.i.l.bf16 %v1979_v16  ;;  %v1984_v21 = vpop.permute.xlu1 %1983 }
 0xa40   :  { %v1986_v22 = vunpack.i.h.bf16 %v1984_v21  ;;  %v1985_v23 = vunpack.i.l.bf16 %v1984_v21 }
 0xa42   :  { %v1260_v24 = vsel %vm2840_vm6, %v1980_v19, %v1985_v23  ;;  %v1261_v25 = vsel %vm2841_vm8, %v1981_v18, %v1986_v22  ;;  %v1264_v38 = vsel %vm2842_vm11, %v1985_v23, %v1980_v19  ;;  %v1265_v26 = vsel %vm2843_vm12, %v1986_v22, %v1981_v18  ;;  %vm2853_vm6 = vmmov %vm2850_vm0 }
 0xa43   :  { %v1714_v27 = vpack.c.bf16 %v1261_v25, %v1260_v24  ;;  %v1717_v29 = vpack.c.bf16 %v1265_v26, %v1264_v38  ;;  %vm2854_vm8 = vmmov %vm2850_vm0  ;;  %vm2856_vm11 = vcmask 523264  }
 0xa44   :  { %vm2857_vm12 = vmmov %vm2856_vm11 }
 0xa45   :  { %1715 = vmatprep.subr.msk.bf16.mxu1 %vm2391_vm4, %v1714_v27 }
 0xa46   :  { %v1989_v30 = vpop.permute.xlu0 %1988  ;;  %1718 = vmatpush1.bf16.msk.msra.mxu1 %vm2395_vm14, %v1717_v29 }
 0xa47   :  { %v1991_v31 = vunpack.i.h.bf16 %v1989_v30  ;;  %v1990_v32 = vunpack.i.l.bf16 %v1989_v30  ;;  %v1999_v42 = vpop.permute.xlu1 %1998 }
 0xa48   :  { %v2001_v33 = vunpack.i.h.bf16 %v1999_v42  ;;  %v2000_v34 = vunpack.i.l.bf16 %v1999_v42 }
 0xa4a   :  { %v1262_v35 = vsel %vm2844_vm9, %v1990_v32, %v2000_v34  ;;  %v1263_v36 = vsel %vm2845_vm1, %v1991_v31, %v2001_v33  ;;  %v1266_v37 = vsel %vm2846_vm2, %v2000_v34, %v1990_v32  ;;  %v1267_v4 = vsel %vm2847_vm13, %v2001_v33, %v1991_v31  ;;  %v1994_v40 = vpop.permute.xlu0 %1993 }
 0xa4b   :  { %v1720_v41 = vpack.c.bf16 %v1263_v36, %v1262_v35  ;;  %v1723_v43 = vpack.c.bf16 %v1267_v4, %v1266_v37  ;;  %v1996_v44 = vunpack.i.h.bf16 %v1994_v40  ;;  %v1995_v45 = vunpack.i.l.bf16 %v1994_v40  ;;  %v2004_v13 = vpop.permute.xlu1 %2003  ;;  %v1413_v35 = vld [vmem:[%s2771_s5] sm:$0x1] }
 0xa4c   :  { %v2006_v46 = vunpack.i.h.bf16 %v2004_v13  ;;  %v2005_v47 = vunpack.i.l.bf16 %v2004_v13 }
 0xa4d   :  { %1721 = vmatprep.subr.msk.bf16.mxu1 %vm2391_vm4, %v1720_v41  ;;  %vm2852_vm4 = vmmov %vm2850_vm0 }
 0xa4e   :  { %v1292_v49 = vsel %vm2848_vm10, %v1995_v45, %v2005_v47  ;;  %v1293_v50 = vsel %vm2849_vm3, %v1996_v44, %v2006_v46  ;;  %v1296_v51 = vsel %vm2850_vm0, %v2005_v47, %v1995_v45  ;;  %v1297_v52 = vsel %vm2851_vm7, %v2006_v46, %v1996_v44  ;;  %v2009_v1 = vpop.permute.xlu0 %2008  ;;  %1724 = vmatpush1.bf16.msk.msra.mxu1 %vm2395_vm14, %v1723_v43  ;;  %vm2855_vm14 = vmmov %vm2850_vm0 }
 0xa4f   :  { %v1726_v53 = vpack.c.bf16 %v1297_v52, %v1296_v51  ;;  %v1729_v55 = vpack.c.bf16 %v1293_v50, %v1292_v49  ;;  %v2011_v17 = vunpack.i.h.bf16 %v2009_v1  ;;  %v2010_v56 = vunpack.i.l.bf16 %v2009_v1  ;;  %v2014_v11 = vpop.permute.xlu1 %2013 }
 0xa50   :  { %v2016_v57 = vunpack.i.h.bf16 %v2014_v11  ;;  %v2015_v58 = vunpack.i.l.bf16 %v2014_v11 }
 0xa51   :  { %1727 = vmatprep.subr.msk.bf16.mxu1 %vm2428_vm5, %v1726_v53 }
 0xa52   :  { %v1294_v6 = vsel %vm2852_vm4, %v2010_v56, %v2015_v58  ;;  %v1295_v59 = vsel %vm2853_vm6, %v2011_v17, %v2016_v57  ;;  %v1298_v20 = vsel %vm2854_vm8, %v2015_v58, %v2010_v56  ;;  %v1299_v60 = vsel %vm2855_vm14, %v2016_v57, %v2011_v17  ;;  %1730 = vmatpush1.bf16.msk.msra.mxu1 %vm2435_vm15, %v1729_v55 }
 0xa53   :  { %v1732_v61 = vpack.c.bf16 %v1299_v60, %v1298_v20  ;;  %v1735_v62 = vpack.c.bf16 %v1295_v59, %v1294_v6 }
 0xa55   :  { %1733 = vmatprep.subr.msk.bf16.mxu1 %vm2428_vm5, %v1732_v61 }
 0xa56   :  { %1736 = vmatpush1.bf16.msk.msra.mxu1 %vm2435_vm15, %v1735_v62  ;;  %vm1424_vm15 = vcmask 261120  }
 0xa59   :  { %1737 = vmatmul.mubr.msk.bf16.vlgmr.msra.gmra.mrb[24].mxu1 %vm2856_vm11, %v2031_v63 }
 0xa5a   :  { %1394 = vmatprep.mubr.bf16.mxu1 %v2057_v3 }
 0xa5f   :  { %v1319_v28 = vpop.permute.xlu0 %1318 }
 0xa60   :  { %v1324_v5 = vpop.permute.xlu1 %1323 }
 0xa61   :  { %1738 = vmatmul.mubr.msk.bf16.gmra.mrb[28].mxu1 %vm2857_vm12, %v2032_v9 }
 0xa63   :  { %v1329_v18 = vpop.permute.xlu0 %1328 }
 0xa64   :  { %v1334_v24 = vpop.permute.xlu1 %1333 }
 0xa67   :  { %v1422_v36 = vpop.permute.xlu0 %1421 }
 0xb2c   :  { %v1386_v48 = vpop.f32.mrb[24].mxu1 }
 0xb2d   :  { %v1387_v0 = vadd.f32 %v1386_v48, %v1319_v28  ;;  %v1388_v2 = vpop.f32.mrb[25].mxu1 }
 0xb2e   :  { %v1389_v7 = vadd.f32 %v1388_v2, %v1319_v28  ;;  %v1390_v8 = vpop.f32.mrb[26].mxu1 }
 0xb2f   :  { %v1391_v39 = vadd.f32 %v1390_v8, %v1324_v5  ;;  %v1392_v54 = vpop.f32.mrb[27].mxu1  ;;  %v1405_v12 = vmax.f32 %v1387_v0, 0.0 }
 0xb30   :  { %v1393_v10 = vadd.f32 %v1392_v54, %v1324_v5  ;;  %v1406_v15 = vmax.f32 %v1389_v7, 0.0 }
 0xb31   :  { %v1407_v14 = vmax.f32 %v1391_v39, 0.0 }
 0xb32   :  { %v1408_v3 = vmax.f32 %v1393_v10, 0.0 }
 0xb33   :  { %v1414_v16 = vpack.c.bf16 %v1407_v14, %v1405_v12 }
 0xb34   :  { %v1415_v19 = vpack.c.bf16 %v1408_v3, %v1406_v15  ;;  %v1396_v21 = vpop.f32.mrb[28].mxu1 }
 0xb35   :  { %v1397_v22 = vadd.f32 %v1396_v21, %v1329_v18  ;;  %v1398_v23 = vpop.f32.mrb[29].mxu1 }
 0xb36   :  { %v1399_v25 = vadd.f32 %v1398_v23, %v1329_v18  ;;  %v1400_v38 = vpop.f32.mrb[30].mxu1  ;;  %1428 = vmatprep.subr.bf16.mxu0 %v1415_v19 }
 0xb37   :  { %v1401_v26 = vadd.f32 %v1400_v38, %v1334_v24  ;;  %v1402_v27 = vpop.f32.mrb[31].mxu1  ;;  %1429 = vmatpush1.bf16.msra.mxu0 %v1414_v16  ;;  %v1409_v30 = vmax.f32 %v1397_v22, 0.0 }
 0xb38   :  { %v1403_v29 = vadd.f32 %v1402_v27, %v1334_v24  ;;  %v1410_v32 = vmax.f32 %v1399_v25, 0.0 }
 0xb39   :  { %v1411_v31 = vmax.f32 %v1401_v26, 0.0 }
 0xb3a   :  { %v1412_v42 = vmax.f32 %v1403_v29, 0.0 }
 0xb3b   :  { %v1416_v33 = vpack.c.bf16 %v1411_v31, %v1409_v30 }
 0xb3c   :  { %v1417_v34 = vpack.c.bf16 %v1412_v42, %v1410_v32 }
 0xb3e   :  { %1430 = vmatprep.subr.bf16.mxu0 %v1417_v34 }
 0xb3f   :  { %1431 = vmatpush1.bf16.msra.mxu0 %v1416_v33 }
 0xb42   :  { %1739 = vmatmul.mubr.msk.bf16.vlgmr.msra.gmra.mrb[32].mxu0 %vm1424_vm15, %v1413_v35 }
 0xc15   :  { %v1462_v37 = vpop.f32.mrb[32].mxu0 }
 0xc16   :  { %v1463_v4 = vadd.f32 %v1462_v37, %v1422_v36  ;;  %v1464_v40 = vpop.f32.mrb[33].mxu0 }
 0xc17   :  { %v1465_v41 = vadd.f32 %v1464_v40, %v1422_v36  ;;  %v1466_v43 = vpop.f32.mrb[34].mxu0 }
 0xc18   :  { %v1469_v44 = vmax.f32 %v1463_v4, 0.0  ;;  %v1467_v45 = vpop.f32.mrb[35].mxu0 }
 0xc19   :  { %v1470_v13 = vmax.f32 %v1465_v41, 0.0 }
 0xc1b   :  { %v1473_v46 = vcombine.low %v1469_v44, %v1470_v13 }
 0xc1d   :  { %1740 = vst.sshfl [vmem:[#allocation2] sm:$0x33 pattern:$0x76325410] %v1473_v46 }
 0xc1e   :  { %2044 = shalt.err (!%p2041_p4)
}
 0xc1f   :  { %s2045_s15 = scalar_lea.hbm %s2773_s7, 64 }
 0xc20   :  { %p2046_p5 = scmp.ne.s32.totalorder %s2773_s7, %s2045_s15  ;;  %p2049_p6 = scmp.lt.u32.totalorder %s2045_s15, %s2773_s7 }
 0xc22   :  { %p2051_p7 = pnand %p2049_p6, %p2046_p5 }
 0xc24   :  { %2054 = shalt.err (!%p2051_p7)
}
 0xc25   :  { %1492 = dma.vmem_to_hbm [thread:$0]  %s1490_s2, 64, %s2773_s7, [#allocation3]  }
 0xc26   :  { %2055 = dma.done.wait [#allocation3], 64  }
 0xc27   :  { %2056 = vsyncadd [#allocation3], 4294967232 }
 0xc28   :  { %1496 = vsyncpa [#allocation3], 1 }

</bundles_post_ra>
